<compile_context>
chip_gen: v5e
topology: v5e:2x2
jax: 0.10.0
libtpu: 0.0.40
codegen_flags: <defaults>
</compile_context>

<pallas_src>
import functools

import jax
import jax.numpy as jnp
from jax.experimental import pallas as pl
from jax.experimental.pallas import tpu as pltpu


# ----------------------------------------------------------------------------
# Pallas kernel
# ----------------------------------------------------------------------------
def _fusion_kernel(n, d_pad, *refs):
    """One batch tile of the full forward pass.

    ref ordering:
      inputs : x_0..x_{n-1}            (TB, in_pad_m)    bf16
               Wp_0..Wp_{n-1}          (in_pad_m, D_pad) bf16
               Wq1                     (n*D_pad, D_pad)  bf16
               Wf1                     (n*D_pad, D_pad)  bf16
               W2 = [mix*Wq2; (1-mix)*Wf2] (2*D_pad, D_pad) bf16
               biases (n+3, D_pad) f32: rows 0..n-1 proj biases, n bq1,
                                        n+1 bf1, n+2 mixed L2 bias
      output : out                     (TB, D_pad) f32
    """
    idx = 0
    x_refs = refs[idx:idx + n]; idx += n
    wp_refs = refs[idx:idx + n]; idx += n
    wq1_ref, wf1_ref, w2_ref, bias_ref = refs[idx:idx + 4]; idx += 4
    out_ref = refs[idx]

    biases = bias_ref[...]                                   # (n+3, D_pad) f32

    # --- per-modality projection + routing + K-split L1 accumulation ---------
    hq = jnp.zeros(out_ref.shape, jnp.float32)               # routed branch
    hf = jnp.zeros(out_ref.shape, jnp.float32)               # full branch
    for m in range(n):
        p = jnp.dot(x_refs[m][...], wp_refs[m][...],
                    preferred_element_type=jnp.float32)
        p = p + biases[m][None, :]                            # (TB, D_pad) f32
        routed = jnp.where(jnp.abs(p) >= 0.05, p, 0.0)        # selective routing

        # 128-aligned static row views of the resident L1 weights (no copy).
        wq_blk = wq1_ref[m * d_pad:(m + 1) * d_pad, :]
        wf_blk = wf1_ref[m * d_pad:(m + 1) * d_pad, :]
        hq = hq + jnp.dot(routed.astype(jnp.bfloat16), wq_blk,
                          preferred_element_type=jnp.float32)
        hf = hf + jnp.dot(p.astype(jnp.bfloat16), wf_blk,
                          preferred_element_type=jnp.float32)

    # --- L1 bias + ReLU -------------------------------------------------------
    hq = jnp.maximum(hq + biases[n][None, :], 0.0).astype(jnp.bfloat16)
    hf = jnp.maximum(hf + biases[n + 1][None, :], 0.0).astype(jnp.bfloat16)

    # --- fused L2 + mix: hq @ (mix*Wq2) + hf @ ((1-mix)*Wf2) + folded bias ----
    out = jnp.dot(hq, w2_ref[:d_pad, :], preferred_element_type=jnp.float32)
    out = out + jnp.dot(hf, w2_ref[d_pad:, :], preferred_element_type=jnp.float32)
    out_ref[...] = (out + biases[n + 2][None, :]).astype(out_ref.dtype)


# ----------------------------------------------------------------------------
# Parameter setup (plain JAX) — mirrors the PyTorch module's init
# ----------------------------------------------------------------------------
def _linear_params(key, in_dim, out_dim):
    """PyTorch nn.Linear default init: U(-1/sqrt(fan_in), 1/sqrt(fan_in))."""
    kw, kb = jax.random.split(key)
    bound = 1.0 / jnp.sqrt(jnp.float32(in_dim))
    W = jax.random.uniform(kw, (in_dim, out_dim), jnp.float32, -bound, bound)
    b = jax.random.uniform(kb, (out_dim,), jnp.float32, -bound, bound)
    return W, b


def _rpb_effective_weight(W, precision_ratio=0.1):
    """ResidualPrecisionBoostLinear effective weight:
    ternary quantization + top-k full-precision residual correction."""
    absW = jnp.abs(W)
    delta = 0.7 * jnp.mean(absW)
    mask = (absW > delta).astype(W.dtype)
    alpha = jnp.sum(absW * mask) / jnp.maximum(jnp.sum(mask), 1.0)
    W_t = alpha * jnp.sign(W) * mask
    residual = W - W_t
    k = max(1, int(round(precision_ratio * W.size)))
    thresh = jnp.sort(jnp.abs(residual).ravel())[-k]
    keep = (jnp.abs(residual) >= thresh).astype(W.dtype)
    return W_t + residual * keep


def init_multimodal_fusion(key, input_dims, output_dim):
    modalities = list(input_dims.keys())
    total_dim = output_dim * len(modalities)
    keys = jax.random.split(key, len(modalities) + 4)

    params = {"proj": {}, "modalities": modalities, "output_dim": output_dim,
              "input_dims": dict(input_dims)}
    for i, m in enumerate(modalities):
        params["proj"][m] = _linear_params(keys[i], input_dims[m], output_dim)

    # fusion_quant : RPB(total->out) -> ReLU -> RPB(out->out)
    Wq1, bq1 = _linear_params(keys[len(modalities) + 0], total_dim, output_dim)
    Wq2, bq2 = _linear_params(keys[len(modalities) + 1], output_dim, output_dim)
    params["quant"] = (_rpb_effective_weight(Wq1), bq1,
                       _rpb_effective_weight(Wq2), bq2)

    # fusion_full : Linear(total->out) -> ReLU -> Linear(out->out)
    Wf1, bf1 = _linear_params(keys[len(modalities) + 2], total_dim, output_dim)
    Wf2, bf2 = _linear_params(keys[len(modalities) + 3], output_dim, output_dim)
    params["full"] = (Wf1, bf1, Wf2, bf2)

    params["mix_ratio"] = jnp.float32(0.75)
    return params


# ----------------------------------------------------------------------------
# One-time weight preprocessing (hoisted out of the per-call wrapper)
# ----------------------------------------------------------------------------
def _round_up(x, m):
    return (x + m - 1) // m * m


def _pad2d(a, rows, cols):
    r, c = a.shape
    return jnp.pad(a, ((0, rows - r), (0, cols - c)))


def prepare_multimodal_fusion_params(params):
    """Pad / cast / fold all weights once; cache the result across forwards.
    Only needs re-running if mix_ratio (or any weight) changes."""
    modalities = params["modalities"]
    D = params["output_dim"]
    n = len(modalities)
    D_pad = _round_up(D, 128)
    total_pad = n * D_pad

    mix = jax.nn.sigmoid(params["mix_ratio"].astype(jnp.float32))  # hoisted

    Wq1, bq1, Wq2, bq2 = params["quant"]
    Wf1, bf1, Wf2, bf2 = params["full"]

    wp, in_pads, bias_rows = [], [], []
    for m in modalities:
        in_dim = params["input_dims"][m]
        in_pad = _round_up(in_dim, 128)
        in_pads.append(in_pad)
        W, b = params["proj"][m]
        wp.append(_pad2d(W.astype(jnp.float32), in_pad, D_pad).astype(jnp.bfloat16))
        bias_rows.append(jnp.pad(b.astype(jnp.float32), (0, D_pad - D)))

    # Remap each modality's D-row block of the L1 weights into the padded
    # (n*D_pad, D_pad) layout matching the per-modality projection columns.
    def pad_l1(W):
        Wp = jnp.zeros((total_pad, D_pad), jnp.float32)
        for mi in range(n):
            Wp = Wp.at[mi * D_pad:mi * D_pad + D, :D].set(W[mi * D:(mi + 1) * D, :])
        return Wp.astype(jnp.bfloat16)

    Wq1_p = pad_l1(Wq1.astype(jnp.float32))
    Wf1_p = pad_l1(Wf1.astype(jnp.float32))

    # Fused second layer: fold sigmoid(mix) into the weights & bias.
    W2_p = jnp.concatenate(
        [mix * _pad2d(Wq2.astype(jnp.float32), D_pad, D_pad),
         (1.0 - mix) * _pad2d(Wf2.astype(jnp.float32), D_pad, D_pad)],
        axis=0).astype(jnp.bfloat16)                              # (2*D_pad, D_pad)
    b2 = mix * bq2.astype(jnp.float32) + (1.0 - mix) * bf2.astype(jnp.float32)

    bias_stack = jnp.stack(
        bias_rows
        + [jnp.pad(bq1.astype(jnp.float32), (0, D_pad - D)),
           jnp.pad(bf1.astype(jnp.float32), (0, D_pad - D)),
           jnp.pad(b2, (0, D_pad - D))],
        axis=0)                                                    # (n+3, D_pad)

    return {
        "modalities": modalities, "output_dim": D,
        "input_dims": dict(params["input_dims"]),
        "n": n, "D_pad": D_pad, "total_pad": total_pad, "in_pads": in_pads,
        "wp": wp, "wq1": Wq1_p, "wf1": Wf1_p, "w2": W2_p, "bias": bias_stack,
    }


# ----------------------------------------------------------------------------
# Wrapper calling pallas_call
# ----------------------------------------------------------------------------
def multimodal_fusion_forward(inputs, prepared, *, tb_max=256):
    modalities = prepared["modalities"]
    D = prepared["output_dim"]
    n = prepared["n"]
    D_pad = prepared["D_pad"]
    total_pad = prepared["total_pad"]
    in_pads = prepared["in_pads"]

    batch = next(iter(inputs.values())).shape[0]

    # --- batch tiling: minimal padding, 16-row bf16 alignment, >=2 tiles on
    #     large batches so the parallel axis can use both v7x TensorCores -----
    nt = pl.cdiv(batch, tb_max)
    if batch > 128:
        nt = max(nt, 2)
    TB = _round_up(pl.cdiv(batch, nt), 16)
    B_full = nt * TB

    # --- per-call activation padding / bf16 cast only -------------------------
    x_args = []
    for m, in_pad in zip(modalities, in_pads):
        x = inputs[m].astype(jnp.float32)
        in_dim = x.shape[1]
        x_p = jnp.pad(x, ((0, B_full - batch), (0, in_pad - in_dim)))
        x_args.append(x_p.astype(jnp.bfloat16))

    kernel_args = (x_args + list(prepared["wp"])
                   + [prepared["wq1"], prepared["wf1"], prepared["w2"],
                      prepared["bias"]])

    # --- generation-aware VMEM budget -----------------------------------------
    weight_bytes = sum(int(w.size) * w.dtype.itemsize
                       for w in list(prepared["wp"])
                       + [prepared["wq1"], prepared["wf1"], prepared["w2"]])
    weight_bytes += int(prepared["bias"].size) * 4
    act_tile_bytes = sum(TB * ip * 2 for ip in in_pads)       # bf16 inputs
    out_tile_bytes = TB * D_pad * 4
    tmp_bytes = 8 * TB * D_pad * 4                             # hq/hf/p working set
    est = weight_bytes + 2 * act_tile_bytes + 2 * out_tile_bytes + tmp_bytes

    try:
        vmem_cap = int(pltpu.get_tpu_info().vmem_capacity_bytes)
    except Exception:
        vmem_cap = 128 * 1024 * 1024
    vmem_limit = int(min(max(int(1.5 * est), 32 * 1024 * 1024),
                         int(0.78 * vmem_cap)))
    # TODO(synk): if weight_bytes alone approaches vmem_limit (large D on v7x),
    #             switch to a K-tiled "arbitrary" grid axis over Wq1/Wf1.

    out_shape = jax.ShapeDtypeStruct((B_full, D_pad), jnp.float32)

    def run(resident_mode):
        def wspec(shape):
            if resident_mode is None:
                return pl.BlockSpec(shape, lambda i: (0, 0))
            return pl.BlockSpec(shape, lambda i: (0, 0),
                                pipeline_mode=resident_mode)

        x_specs = [pl.BlockSpec((TB, ip), lambda i: (i, 0)) for ip in in_pads]
        in_specs = (x_specs
                    + [wspec((ip, D_pad)) for ip in in_pads]
                    + [wspec((total_pad, D_pad)),
                       wspec((total_pad, D_pad)),
                       wspec((2 * D_pad, D_pad)),
                       wspec((n + 3, D_pad))])

        return pl.pallas_call(
            functools.partial(_fusion_kernel, n, D_pad),
            out_shape=out_shape,
            grid=(B_full // TB,),
            in_specs=in_specs,
            out_specs=pl.BlockSpec((TB, D_pad), lambda i: (i, 0)),
            compiler_params=pltpu.CompilerParams(
                dimension_semantics=("parallel",),
                vmem_limit_bytes=vmem_limit),
        )(*kernel_args)

    try:
        # Constant index_map weights: request single buffering (halves the
        # dominant VMEM consumer vs. default double-buffering).
        out = run(pl.Buffered(1))
    except Exception:
        # Fallback if this jax build rejects pipeline_mode / Buffered(1).
        out = run(None)

    return out[:batch, :D]


# ----------------------------------------------------------------------------
# Pure-JAX reference (f32) for a sanity check
# ----------------------------------------------------------------------------
def _reference_forward(inputs, params):
    modalities = params["modalities"]
    proj = [inputs[m].astype(jnp.float32) @ params["proj"][m][0]
            + params["proj"][m][1] for m in modalities]
    cat = jnp.concatenate(proj, axis=1)
    routed = jnp.where(jnp.abs(cat) >= 0.05, cat, 0.0)
    Wq1, bq1, Wq2, bq2 = params["quant"]
    Wf1, bf1, Wf2, bf2 = params["full"]
    oq = jnp.maximum(routed @ Wq1 + bq1, 0.0) @ Wq2 + bq2
    of = jnp.maximum(cat @ Wf1 + bf1, 0.0) @ Wf2 + bf2
    mix = jax.nn.sigmoid(params["mix_ratio"])
    return mix * oq + (1.0 - mix) * of


# ----------------------------------------------------------------------------
if __name__ == "__main__":
    key = jax.random.PRNGKey(0)
    input_dims = {"vision": 16, "text": 24}   # modality -> feature dim
    output_dim = 32
    batch = 4

    k_params, k_v, k_t = jax.random.split(key, 3)
    params = init_multimodal_fusion(k_params, input_dims, output_dim)
    prepared = prepare_multimodal_fusion_params(params)   # one-time weight prep

    inputs = {
        "vision": jax.random.normal(k_v, (batch, input_dims["vision"]), jnp.float32),
        "text": jax.random.normal(k_t, (batch, input_dims["text"]), jnp.float32),
    }

    out = multimodal_fusion_forward(inputs, prepared)
    jax.block_until_ready(out)
    assert out.shape == (batch, output_dim)

    ref = _reference_forward(inputs, params)
    # bf16 MXU path -> loose tolerance; catches structural/wiring errors.
    assert bool(jnp.allclose(out, ref, rtol=1e-1, atol=1e-1)), "mismatch vs reference"

    print("KERNEL_OK")
</pallas_src>

<mosaic_0001>
module attributes {stable_mosaic.version = 11 : i64} {
  func.func @_fusion_kernel(%arg0: i32, %arg1: memref<16x128xbf16, #tpu.memory_space<vmem>>, %arg2: memref<16x128xbf16, #tpu.memory_space<vmem>>, %arg3: memref<128x128xbf16, #tpu.memory_space<vmem>>, %arg4: memref<128x128xbf16, #tpu.memory_space<vmem>>, %arg5: memref<256x128xbf16, #tpu.memory_space<vmem>>, %arg6: memref<256x128xbf16, #tpu.memory_space<vmem>>, %arg7: memref<256x128xbf16, #tpu.memory_space<vmem>>, %arg8: memref<5x128xf32, #tpu.memory_space<vmem>>, %arg9: memref<16x128xf32, #tpu.memory_space<vmem>>) attributes {dimension_semantics = [#tpu.dimension_semantics<parallel>], iteration_bounds = array<i64: 1>, scalar_prefetch = 0 : i64, scratch_operands = 0 : i64, tpu.core_type = #tpu.core_type<tc>, window_params = [{transform_indices = @transform_0, window_bounds = array<i64: 16, 128>}, {transform_indices = @transform_1, window_bounds = array<i64: 16, 128>}, {pipeline_mode = #tpu.pipeline_mode<synchronous>, transform_indices = @transform_2, window_bounds = array<i64: 128, 128>}, {pipeline_mode = #tpu.pipeline_mode<synchronous>, transform_indices = @transform_3, window_bounds = array<i64: 128, 128>}, {pipeline_mode = #tpu.pipeline_mode<synchronous>, transform_indices = @transform_4, window_bounds = array<i64: 256, 128>}, {pipeline_mode = #tpu.pipeline_mode<synchronous>, transform_indices = @transform_5, window_bounds = array<i64: 256, 128>}, {pipeline_mode = #tpu.pipeline_mode<synchronous>, transform_indices = @transform_6, window_bounds = array<i64: 256, 128>}, {pipeline_mode = #tpu.pipeline_mode<synchronous>, transform_indices = @transform_7, window_bounds = array<i64: 5, 128>}, {transform_indices = @transform_8, window_bounds = array<i64: 16, 128>}]} {
    %c0 = arith.constant 0 : index
    %c0_0 = arith.constant 0 : index
    %0 = vector.load %arg8[%c0, %c0_0] : memref<5x128xf32, #tpu.memory_space<vmem>>, vector<5x128xf32>
    %cst = arith.constant 0.000000e+00 : f32
    %1 = vector.broadcast %cst : f32 to vector<16x128xf32>
    %cst_1 = arith.constant 0.000000e+00 : f32
    %2 = vector.broadcast %cst_1 : f32 to vector<16x128xf32>
    %c0_2 = arith.constant 0 : index
    %c0_3 = arith.constant 0 : index
    %3 = vector.load %arg1[%c0_2, %c0_3] : memref<16x128xbf16, #tpu.memory_space<vmem>>, vector<16x128xbf16>
    %c0_4 = arith.constant 0 : index
    %c0_5 = arith.constant 0 : index
    %4 = vector.load %arg3[%c0_4, %c0_5] : memref<128x128xbf16, #tpu.memory_space<vmem>>, vector<128x128xbf16>
    %cst_6 = arith.constant dense<0.000000e+00> : vector<16x128xf32>
    %5 = tpu.matmul %3, %4, %cst_6 {dimension_numbers = #tpu.dot_dimension_numbers<[1], [0], [0], [1], [0, 0, 1, 1], [], []>} : vector<16x128xbf16>, vector<128x128xbf16>, vector<16x128xf32> -> vector<16x128xf32>
    %6 = vector.extract_strided_slice %0 {offsets = [0, 0], sizes = [1, 128], strides = [1, 1]} : vector<5x128xf32> to vector<1x128xf32>
    %7 = vector.shape_cast %6 : vector<1x128xf32> to vector<128xf32>
    %8 = vector.shape_cast %7 : vector<128xf32> to vector<1x128xf32>
    %9 = vector.broadcast %8 : vector<1x128xf32> to vector<16x128xf32>
    %10 = arith.addf %5, %9 : vector<16x128xf32>
    %11 = math.absf %10 : vector<16x128xf32>
    %cst_7 = arith.constant 5.000000e-02 : f32
    %12 = vector.broadcast %cst_7 : f32 to vector<16x128xf32>
    %13 = arith.cmpf oge, %11, %12 : vector<16x128xf32>
    %cst_8 = arith.constant 0.000000e+00 : f32
    %14 = vector.broadcast %cst_8 : f32 to vector<16x128xf32>
    %15 = arith.select %13, %10, %14 : vector<16x128xi1>, vector<16x128xf32>
    %c0_9 = arith.constant 0 : index
    %c0_10 = arith.constant 0 : index
    %16 = vector.load %arg5[%c0_9, %c0_10] : memref<256x128xbf16, #tpu.memory_space<vmem>>, vector<128x128xbf16>
    %c0_11 = arith.constant 0 : index
    %c0_12 = arith.constant 0 : index
    %17 = vector.load %arg6[%c0_11, %c0_12] : memref<256x128xbf16, #tpu.memory_space<vmem>>, vector<128x128xbf16>
    %18 = arith.truncf %15 : vector<16x128xf32> to vector<16x128xbf16>
    %cst_13 = arith.constant dense<0.000000e+00> : vector<16x128xf32>
    %19 = tpu.matmul %18, %16, %cst_13 {dimension_numbers = #tpu.dot_dimension_numbers<[1], [0], [0], [1], [0, 0, 1, 1], [], []>} : vector<16x128xbf16>, vector<128x128xbf16>, vector<16x128xf32> -> vector<16x128xf32>
    %20 = arith.addf %1, %19 : vector<16x128xf32>
    %21 = arith.truncf %10 : vector<16x128xf32> to vector<16x128xbf16>
    %cst_14 = arith.constant dense<0.000000e+00> : vector<16x128xf32>
    %22 = tpu.matmul %21, %17, %cst_14 {dimension_numbers = #tpu.dot_dimension_numbers<[1], [0], [0], [1], [0, 0, 1, 1], [], []>} : vector<16x128xbf16>, vector<128x128xbf16>, vector<16x128xf32> -> vector<16x128xf32>
    %23 = arith.addf %2, %22 : vector<16x128xf32>
    %c0_15 = arith.constant 0 : index
    %c0_16 = arith.constant 0 : index
    %24 = vector.load %arg2[%c0_15, %c0_16] : memref<16x128xbf16, #tpu.memory_space<vmem>>, vector<16x128xbf16>
    %c0_17 = arith.constant 0 : index
    %c0_18 = arith.constant 0 : index
    %25 = vector.load %arg4[%c0_17, %c0_18] : memref<128x128xbf16, #tpu.memory_space<vmem>>, vector<128x128xbf16>
    %cst_19 = arith.constant dense<0.000000e+00> : vector<16x128xf32>
    %26 = tpu.matmul %24, %25, %cst_19 {dimension_numbers = #tpu.dot_dimension_numbers<[1], [0], [0], [1], [0, 0, 1, 1], [], []>} : vector<16x128xbf16>, vector<128x128xbf16>, vector<16x128xf32> -> vector<16x128xf32>
    %27 = vector.extract_strided_slice %0 {offsets = [1, 0], sizes = [1, 128], strides = [1, 1]} : vector<5x128xf32> to vector<1x128xf32>
    %28 = vector.shape_cast %27 : vector<1x128xf32> to vector<128xf32>
    %29 = vector.shape_cast %28 : vector<128xf32> to vector<1x128xf32>
    %30 = vector.broadcast %29 : vector<1x128xf32> to vector<16x128xf32>
    %31 = arith.addf %26, %30 : vector<16x128xf32>
    %32 = math.absf %31 : vector<16x128xf32>
    %cst_20 = arith.constant 5.000000e-02 : f32
    %33 = vector.broadcast %cst_20 : f32 to vector<16x128xf32>
    %34 = arith.cmpf oge, %32, %33 : vector<16x128xf32>
    %cst_21 = arith.constant 0.000000e+00 : f32
    %35 = vector.broadcast %cst_21 : f32 to vector<16x128xf32>
    %36 = arith.select %34, %31, %35 : vector<16x128xi1>, vector<16x128xf32>
    %c128 = arith.constant 128 : index
    %c0_22 = arith.constant 0 : index
    %37 = vector.load %arg5[%c128, %c0_22] : memref<256x128xbf16, #tpu.memory_space<vmem>>, vector<128x128xbf16>
    %c128_23 = arith.constant 128 : index
    %c0_24 = arith.constant 0 : index
    %38 = vector.load %arg6[%c128_23, %c0_24] : memref<256x128xbf16, #tpu.memory_space<vmem>>, vector<128x128xbf16>
    %39 = arith.truncf %36 : vector<16x128xf32> to vector<16x128xbf16>
    %cst_25 = arith.constant dense<0.000000e+00> : vector<16x128xf32>
    %40 = tpu.matmul %39, %37, %cst_25 {dimension_numbers = #tpu.dot_dimension_numbers<[1], [0], [0], [1], [0, 0, 1, 1], [], []>} : vector<16x128xbf16>, vector<128x128xbf16>, vector<16x128xf32> -> vector<16x128xf32>
    %41 = arith.addf %20, %40 : vector<16x128xf32>
    %42 = arith.truncf %31 : vector<16x128xf32> to vector<16x128xbf16>
    %cst_26 = arith.constant dense<0.000000e+00> : vector<16x128xf32>
    %43 = tpu.matmul %42, %38, %cst_26 {dimension_numbers = #tpu.dot_dimension_numbers<[1], [0], [0], [1], [0, 0, 1, 1], [], []>} : vector<16x128xbf16>, vector<128x128xbf16>, vector<16x128xf32> -> vector<16x128xf32>
    %44 = arith.addf %23, %43 : vector<16x128xf32>
    %45 = vector.extract_strided_slice %0 {offsets = [2, 0], sizes = [1, 128], strides = [1, 1]} : vector<5x128xf32> to vector<1x128xf32>
    %46 = vector.shape_cast %45 : vector<1x128xf32> to vector<128xf32>
    %47 = vector.shape_cast %46 : vector<128xf32> to vector<1x128xf32>
    %48 = vector.broadcast %47 : vector<1x128xf32> to vector<16x128xf32>
    %49 = arith.addf %41, %48 : vector<16x128xf32>
    %cst_27 = arith.constant 0.000000e+00 : f32
    %50 = vector.broadcast %cst_27 : f32 to vector<16x128xf32>
    %51 = arith.maximumf %49, %50 : vector<16x128xf32>
    %52 = arith.truncf %51 : vector<16x128xf32> to vector<16x128xbf16>
    %53 = vector.extract_strided_slice %0 {offsets = [3, 0], sizes = [1, 128], strides = [1, 1]} : vector<5x128xf32> to vector<1x128xf32>
    %54 = vector.shape_cast %53 : vector<1x128xf32> to vector<128xf32>
    %55 = vector.shape_cast %54 : vector<128xf32> to vector<1x128xf32>
    %56 = vector.broadcast %55 : vector<1x128xf32> to vector<16x128xf32>
    %57 = arith.addf %44, %56 : vector<16x128xf32>
    %cst_28 = arith.constant 0.000000e+00 : f32
    %58 = vector.broadcast %cst_28 : f32 to vector<16x128xf32>
    %59 = arith.maximumf %57, %58 : vector<16x128xf32>
    %60 = arith.truncf %59 : vector<16x128xf32> to vector<16x128xbf16>
    %c0_29 = arith.constant 0 : index
    %c0_30 = arith.constant 0 : index
    %61 = vector.load %arg7[%c0_29, %c0_30] : memref<256x128xbf16, #tpu.memory_space<vmem>>, vector<128x128xbf16>
    %cst_31 = arith.constant dense<0.000000e+00> : vector<16x128xf32>
    %62 = tpu.matmul %52, %61, %cst_31 {dimension_numbers = #tpu.dot_dimension_numbers<[1], [0], [0], [1], [0, 0, 1, 1], [], []>} : vector<16x128xbf16>, vector<128x128xbf16>, vector<16x128xf32> -> vector<16x128xf32>
    %c128_32 = arith.constant 128 : index
    %c0_33 = arith.constant 0 : index
    %63 = vector.load %arg7[%c128_32, %c0_33] : memref<256x128xbf16, #tpu.memory_space<vmem>>, vector<128x128xbf16>
    %cst_34 = arith.constant dense<0.000000e+00> : vector<16x128xf32>
    %64 = tpu.matmul %60, %63, %cst_34 {dimension_numbers = #tpu.dot_dimension_numbers<[1], [0], [0], [1], [0, 0, 1, 1], [], []>} : vector<16x128xbf16>, vector<128x128xbf16>, vector<16x128xf32> -> vector<16x128xf32>
    %65 = arith.addf %62, %64 : vector<16x128xf32>
    %66 = vector.extract_strided_slice %0 {offsets = [4, 0], sizes = [1, 128], strides = [1, 1]} : vector<5x128xf32> to vector<1x128xf32>
    %67 = vector.shape_cast %66 : vector<1x128xf32> to vector<128xf32>
    %68 = vector.shape_cast %67 : vector<128xf32> to vector<1x128xf32>
    %69 = vector.broadcast %68 : vector<1x128xf32> to vector<16x128xf32>
    %70 = arith.addf %65, %69 : vector<16x128xf32>
    %c0_35 = arith.constant 0 : index
    %c0_36 = arith.constant 0 : index
    %71 = vector.load %arg9[%c0_35, %c0_36] : memref<16x128xf32, #tpu.memory_space<vmem>>, vector<16x128xf32>
    tpu.vector_store %arg9[%c0_35, %c0_36], %70 {strides = array<i32>} : memref<16x128xf32, #tpu.memory_space<vmem>>, vector<16x128xf32>,
    return
  }
  func.func @transform_0(%arg0: i32) -> (i32, i32) {
    %c0_i32 = arith.constant 0 : i32
    %c0_i32_0 = arith.constant 0 : i32
    return %arg0, %c0_i32 : i32, i32
  }
  func.func @transform_1(%arg0: i32) -> (i32, i32) {
    %c0_i32 = arith.constant 0 : i32
    %c0_i32_0 = arith.constant 0 : i32
    return %arg0, %c0_i32 : i32, i32
  }
  func.func @transform_2(%arg0: i32) -> (i32, i32) {
    %c0_i32 = arith.constant 0 : i32
    %c0_i32_0 = arith.constant 0 : i32
    %c0_i32_1 = arith.constant 0 : i32
    return %c0_i32, %c0_i32_0 : i32, i32
  }
  func.func @transform_3(%arg0: i32) -> (i32, i32) {
    %c0_i32 = arith.constant 0 : i32
    %c0_i32_0 = arith.constant 0 : i32
    %c0_i32_1 = arith.constant 0 : i32
    return %c0_i32, %c0_i32_0 : i32, i32
  }
  func.func @transform_4(%arg0: i32) -> (i32, i32) {
    %c0_i32 = arith.constant 0 : i32
    %c0_i32_0 = arith.constant 0 : i32
    %c0_i32_1 = arith.constant 0 : i32
    return %c0_i32, %c0_i32_0 : i32, i32
  }
  func.func @transform_5(%arg0: i32) -> (i32, i32) {
    %c0_i32 = arith.constant 0 : i32
    %c0_i32_0 = arith.constant 0 : i32
    %c0_i32_1 = arith.constant 0 : i32
    return %c0_i32, %c0_i32_0 : i32, i32
  }
  func.func @transform_6(%arg0: i32) -> (i32, i32) {
    %c0_i32 = arith.constant 0 : i32
    %c0_i32_0 = arith.constant 0 : i32
    %c0_i32_1 = arith.constant 0 : i32
    return %c0_i32, %c0_i32_0 : i32, i32
  }
  func.func @transform_7(%arg0: i32) -> (i32, i32) {
    %c0_i32 = arith.constant 0 : i32
    %c0_i32_0 = arith.constant 0 : i32
    %c0_i32_1 = arith.constant 0 : i32
    return %c0_i32, %c0_i32_0 : i32, i32
  }
  func.func @transform_8(%arg0: i32) -> (i32, i32) {
    %c0_i32 = arith.constant 0 : i32
    %c0_i32_0 = arith.constant 0 : i32
    return %arg0, %c0_i32 : i32, i32
  }
}

module attributes {stable_mosaic.version = 11 : i64} {
  func.func @_fusion_kernel(%arg0: i32, %arg1: memref<16x128xbf16, #tpu.memory_space<vmem>>, %arg2: memref<16x128xbf16, #tpu.memory_space<vmem>>, %arg3: memref<128x128xbf16, #tpu.memory_space<vmem>>, %arg4: memref<128x128xbf16, #tpu.memory_space<vmem>>, %arg5: memref<256x128xbf16, #tpu.memory_space<vmem>>, %arg6: memref<256x128xbf16, #tpu.memory_space<vmem>>, %arg7: memref<256x128xbf16, #tpu.memory_space<vmem>>, %arg8: memref<5x128xf32, #tpu.memory_space<vmem>>, %arg9: memref<16x128xf32, #tpu.memory_space<vmem>>) attributes {dimension_semantics = [#tpu.dimension_semantics<parallel>], iteration_bounds = array<i64: 1>, scalar_prefetch = 0 : i64, scratch_operands = 0 : i64, tpu.core_type = #tpu.core_type<tc>, window_params = [{transform_indices = @transform_0, window_bounds = array<i64: 16, 128>}, {transform_indices = @transform_1, window_bounds = array<i64: 16, 128>}, {pipeline_mode = #tpu.pipeline_mode<synchronous>, transform_indices = @transform_2, window_bounds = array<i64: 128, 128>}, {pipeline_mode = #tpu.pipeline_mode<synchronous>, transform_indices = @transform_3, window_bounds = array<i64: 128, 128>}, {pipeline_mode = #tpu.pipeline_mode<synchronous>, transform_indices = @transform_4, window_bounds = array<i64: 256, 128>}, {pipeline_mode = #tpu.pipeline_mode<synchronous>, transform_indices = @transform_5, window_bounds = array<i64: 256, 128>}, {pipeline_mode = #tpu.pipeline_mode<synchronous>, transform_indices = @transform_6, window_bounds = array<i64: 256, 128>}, {pipeline_mode = #tpu.pipeline_mode<synchronous>, transform_indices = @transform_7, window_bounds = array<i64: 5, 128>}, {transform_indices = @transform_8, window_bounds = array<i64: 16, 128>}]} {
    %c0 = arith.constant 0 : index
    %c0_0 = arith.constant 0 : index
    %0 = vector.load %arg8[%c0, %c0_0] : memref<5x128xf32, #tpu.memory_space<vmem>>, vector<5x128xf32>
    %cst = arith.constant 0.000000e+00 : f32
    %1 = vector.broadcast %cst : f32 to vector<16x128xf32>
    %cst_1 = arith.constant 0.000000e+00 : f32
    %2 = vector.broadcast %cst_1 : f32 to vector<16x128xf32>
    %c0_2 = arith.constant 0 : index
    %c0_3 = arith.constant 0 : index
    %3 = vector.load %arg1[%c0_2, %c0_3] : memref<16x128xbf16, #tpu.memory_space<vmem>>, vector<16x128xbf16>
    %c0_4 = arith.constant 0 : index
    %c0_5 = arith.constant 0 : index
    %4 = vector.load %arg3[%c0_4, %c0_5] : memref<128x128xbf16, #tpu.memory_space<vmem>>, vector<128x128xbf16>
    %cst_6 = arith.constant dense<0.000000e+00> : vector<16x128xf32>
    %5 = tpu.matmul %3, %4, %cst_6 {dimension_numbers = #tpu.dot_dimension_numbers<[1], [0], [0], [1], [0, 0, 1, 1], [], []>} : vector<16x128xbf16>, vector<128x128xbf16>, vector<16x128xf32> -> vector<16x128xf32>
    %6 = vector.extract_strided_slice %0 {offsets = [0, 0], sizes = [1, 128], strides = [1, 1]} : vector<5x128xf32> to vector<1x128xf32>
    %7 = vector.shape_cast %6 : vector<1x128xf32> to vector<128xf32>
    %8 = vector.shape_cast %7 : vector<128xf32> to vector<1x128xf32>
    %9 = vector.broadcast %8 : vector<1x128xf32> to vector<16x128xf32>
    %10 = arith.addf %5, %9 : vector<16x128xf32>
    %11 = math.absf %10 : vector<16x128xf32>
    %cst_7 = arith.constant 5.000000e-02 : f32
    %12 = vector.broadcast %cst_7 : f32 to vector<16x128xf32>
    %13 = arith.cmpf oge, %11, %12 : vector<16x128xf32>
    %cst_8 = arith.constant 0.000000e+00 : f32
    %14 = vector.broadcast %cst_8 : f32 to vector<16x128xf32>
    %15 = arith.select %13, %10, %14 : vector<16x128xi1>, vector<16x128xf32>
    %c0_9 = arith.constant 0 : index
    %c0_10 = arith.constant 0 : index
    %16 = vector.load %arg5[%c0_9, %c0_10] : memref<256x128xbf16, #tpu.memory_space<vmem>>, vector<128x128xbf16>
    %c0_11 = arith.constant 0 : index
    %c0_12 = arith.constant 0 : index
    %17 = vector.load %arg6[%c0_11, %c0_12] : memref<256x128xbf16, #tpu.memory_space<vmem>>, vector<128x128xbf16>
    %18 = arith.truncf %15 : vector<16x128xf32> to vector<16x128xbf16>
    %cst_13 = arith.constant dense<0.000000e+00> : vector<16x128xf32>
    %19 = tpu.matmul %18, %16, %cst_13 {dimension_numbers = #tpu.dot_dimension_numbers<[1], [0], [0], [1], [0, 0, 1, 1], [], []>} : vector<16x128xbf16>, vector<128x128xbf16>, vector<16x128xf32> -> vector<16x128xf32>
    %20 = arith.addf %1, %19 : vector<16x128xf32>
    %21 = arith.truncf %10 : vector<16x128xf32> to vector<16x128xbf16>
    %cst_14 = arith.constant dense<0.000000e+00> : vector<16x128xf32>
    %22 = tpu.matmul %21, %17, %cst_14 {dimension_numbers = #tpu.dot_dimension_numbers<[1], [0], [0], [1], [0, 0, 1, 1], [], []>} : vector<16x128xbf16>, vector<128x128xbf16>, vector<16x128xf32> -> vector<16x128xf32>
    %23 = arith.addf %2, %22 : vector<16x128xf32>
    %c0_15 = arith.constant 0 : index
    %c0_16 = arith.constant 0 : index
    %24 = vector.load %arg2[%c0_15, %c0_16] : memref<16x128xbf16, #tpu.memory_space<vmem>>, vector<16x128xbf16>
    %c0_17 = arith.constant 0 : index
    %c0_18 = arith.constant 0 : index
    %25 = vector.load %arg4[%c0_17, %c0_18] : memref<128x128xbf16, #tpu.memory_space<vmem>>, vector<128x128xbf16>
    %cst_19 = arith.constant dense<0.000000e+00> : vector<16x128xf32>
    %26 = tpu.matmul %24, %25, %cst_19 {dimension_numbers = #tpu.dot_dimension_numbers<[1], [0], [0], [1], [0, 0, 1, 1], [], []>} : vector<16x128xbf16>, vector<128x128xbf16>, vector<16x128xf32> -> vector<16x128xf32>
    %27 = vector.extract_strided_slice %0 {offsets = [1, 0], sizes = [1, 128], strides = [1, 1]} : vector<5x128xf32> to vector<1x128xf32>
    %28 = vector.shape_cast %27 : vector<1x128xf32> to vector<128xf32>
    %29 = vector.shape_cast %28 : vector<128xf32> to vector<1x128xf32>
    %30 = vector.broadcast %29 : vector<1x128xf32> to vector<16x128xf32>
    %31 = arith.addf %26, %30 : vector<16x128xf32>
    %32 = math.absf %31 : vector<16x128xf32>
    %cst_20 = arith.constant 5.000000e-02 : f32
    %33 = vector.broadcast %cst_20 : f32 to vector<16x128xf32>
    %34 = arith.cmpf oge, %32, %33 : vector<16x128xf32>
    %cst_21 = arith.constant 0.000000e+00 : f32
    %35 = vector.broadcast %cst_21 : f32 to vector<16x128xf32>
    %36 = arith.select %34, %31, %35 : vector<16x128xi1>, vector<16x128xf32>
    %c128 = arith.constant 128 : index
    %c0_22 = arith.constant 0 : index
    %37 = vector.load %arg5[%c128, %c0_22] : memref<256x128xbf16, #tpu.memory_space<vmem>>, vector<128x128xbf16>
    %c128_23 = arith.constant 128 : index
    %c0_24 = arith.constant 0 : index
    %38 = vector.load %arg6[%c128_23, %c0_24] : memref<256x128xbf16, #tpu.memory_space<vmem>>, vector<128x128xbf16>
    %39 = arith.truncf %36 : vector<16x128xf32> to vector<16x128xbf16>
    %cst_25 = arith.constant dense<0.000000e+00> : vector<16x128xf32>
    %40 = tpu.matmul %39, %37, %cst_25 {dimension_numbers = #tpu.dot_dimension_numbers<[1], [0], [0], [1], [0, 0, 1, 1], [], []>} : vector<16x128xbf16>, vector<128x128xbf16>, vector<16x128xf32> -> vector<16x128xf32>
    %41 = arith.addf %20, %40 : vector<16x128xf32>
    %42 = arith.truncf %31 : vector<16x128xf32> to vector<16x128xbf16>
    %cst_26 = arith.constant dense<0.000000e+00> : vector<16x128xf32>
    %43 = tpu.matmul %42, %38, %cst_26 {dimension_numbers = #tpu.dot_dimension_numbers<[1], [0], [0], [1], [0, 0, 1, 1], [], []>} : vector<16x128xbf16>, vector<128x128xbf16>, vector<16x128xf32> -> vector<16x128xf32>
    %44 = arith.addf %23, %43 : vector<16x128xf32>
    %45 = vector.extract_strided_slice %0 {offsets = [2, 0], sizes = [1, 128], strides = [1, 1]} : vector<5x128xf32> to vector<1x128xf32>
    %46 = vector.shape_cast %45 : vector<1x128xf32> to vector<128xf32>
    %47 = vector.shape_cast %46 : vector<128xf32> to vector<1x128xf32>
    %48 = vector.broadcast %47 : vector<1x128xf32> to vector<16x128xf32>
    %49 = arith.addf %41, %48 : vector<16x128xf32>
    %cst_27 = arith.constant 0.000000e+00 : f32
    %50 = vector.broadcast %cst_27 : f32 to vector<16x128xf32>
    %51 = arith.maximumf %49, %50 : vector<16x128xf32>
    %52 = arith.truncf %51 : vector<16x128xf32> to vector<16x128xbf16>
    %53 = vector.extract_strided_slice %0 {offsets = [3, 0], sizes = [1, 128], strides = [1, 1]} : vector<5x128xf32> to vector<1x128xf32>
    %54 = vector.shape_cast %53 : vector<1x128xf32> to vector<128xf32>
    %55 = vector.shape_cast %54 : vector<128xf32> to vector<1x128xf32>
    %56 = vector.broadcast %55 : vector<1x128xf32> to vector<16x128xf32>
    %57 = arith.addf %44, %56 : vector<16x128xf32>
    %cst_28 = arith.constant 0.000000e+00 : f32
    %58 = vector.broadcast %cst_28 : f32 to vector<16x128xf32>
    %59 = arith.maximumf %57, %58 : vector<16x128xf32>
    %60 = arith.truncf %59 : vector<16x128xf32> to vector<16x128xbf16>
    %c0_29 = arith.constant 0 : index
    %c0_30 = arith.constant 0 : index
    %61 = vector.load %arg7[%c0_29, %c0_30] : memref<256x128xbf16, #tpu.memory_space<vmem>>, vector<128x128xbf16>
    %cst_31 = arith.constant dense<0.000000e+00> : vector<16x128xf32>
    %62 = tpu.matmul %52, %61, %cst_31 {dimension_numbers = #tpu.dot_dimension_numbers<[1], [0], [0], [1], [0, 0, 1, 1], [], []>} : vector<16x128xbf16>, vector<128x128xbf16>, vector<16x128xf32> -> vector<16x128xf32>
    %c128_32 = arith.constant 128 : index
    %c0_33 = arith.constant 0 : index
    %63 = vector.load %arg7[%c128_32, %c0_33] : memref<256x128xbf16, #tpu.memory_space<vmem>>, vector<128x128xbf16>
    %cst_34 = arith.constant dense<0.000000e+00> : vector<16x128xf32>
    %64 = tpu.matmul %60, %63, %cst_34 {dimension_numbers = #tpu.dot_dimension_numbers<[1], [0], [0], [1], [0, 0, 1, 1], [], []>} : vector<16x128xbf16>, vector<128x128xbf16>, vector<16x128xf32> -> vector<16x128xf32>
    %65 = arith.addf %62, %64 : vector<16x128xf32>
    %66 = vector.extract_strided_slice %0 {offsets = [4, 0], sizes = [1, 128], strides = [1, 1]} : vector<5x128xf32> to vector<1x128xf32>
    %67 = vector.shape_cast %66 : vector<1x128xf32> to vector<128xf32>
    %68 = vector.shape_cast %67 : vector<128xf32> to vector<1x128xf32>
    %69 = vector.broadcast %68 : vector<1x128xf32> to vector<16x128xf32>
    %70 = arith.addf %65, %69 : vector<16x128xf32>
    %c0_35 = arith.constant 0 : index
    %c0_36 = arith.constant 0 : index
    %71 = vector.load %arg9[%c0_35, %c0_36] : memref<16x128xf32, #tpu.memory_space<vmem>>, vector<16x128xf32>
    tpu.vector_store %arg9[%c0_35, %c0_36], %70 {strides = array<i32>} : memref<16x128xf32, #tpu.memory_space<vmem>>, vector<16x128xf32>,
    return
  }
  func.func @transform_0(%arg0: i32) -> (i32, i32) {
    %c0_i32 = arith.constant 0 : i32
    %c0_i32_0 = arith.constant 0 : i32
    return %arg0, %c0_i32 : i32, i32
  }
  func.func @transform_1(%arg0: i32) -> (i32, i32) {
    %c0_i32 = arith.constant 0 : i32
    %c0_i32_0 = arith.constant 0 : i32
    return %arg0, %c0_i32 : i32, i32
  }
  func.func @transform_2(%arg0: i32) -> (i32, i32) {
    %c0_i32 = arith.constant 0 : i32
    %c0_i32_0 = arith.constant 0 : i32
    %c0_i32_1 = arith.constant 0 : i32
    return %c0_i32, %c0_i32_0 : i32, i32
  }
  func.func @transform_3(%arg0: i32) -> (i32, i32) {
    %c0_i32 = arith.constant 0 : i32
    %c0_i32_0 = arith.constant 0 : i32
    %c0_i32_1 = arith.constant 0 : i32
    return %c0_i32, %c0_i32_0 : i32, i32
  }
  func.func @transform_4(%arg0: i32) -> (i32, i32) {
    %c0_i32 = arith.constant 0 : i32
    %c0_i32_0 = arith.constant 0 : i32
    %c0_i32_1 = arith.constant 0 : i32
    return %c0_i32, %c0_i32_0 : i32, i32
  }
  func.func @transform_5(%arg0: i32) -> (i32, i32) {
    %c0_i32 = arith.constant 0 : i32
    %c0_i32_0 = arith.constant 0 : i32
    %c0_i32_1 = arith.constant 0 : i32
    return %c0_i32, %c0_i32_0 : i32, i32
  }
  func.func @transform_6(%arg0: i32) -> (i32, i32) {
    %c0_i32 = arith.constant 0 : i32
    %c0_i32_0 = arith.constant 0 : i32
    %c0_i32_1 = arith.constant 0 : i32
    return %c0_i32, %c0_i32_0 : i32, i32
  }
  func.func @transform_7(%arg0: i32) -> (i32, i32) {
    %c0_i32 = arith.constant 0 : i32
    %c0_i32_0 = arith.constant 0 : i32
    %c0_i32_1 = arith.constant 0 : i32
    return %c0_i32, %c0_i32_0 : i32, i32
  }
  func.func @transform_8(%arg0: i32) -> (i32, i32) {
    %c0_i32 = arith.constant 0 : i32
    %c0_i32_0 = arith.constant 0 : i32
    return %arg0, %c0_i32 : i32, i32
  }
}

</mosaic_0001>

<bundles_post_ra>
// kernel: tpu_custom_call.1
= control target key start
LH: loop header
LB: loop body
LE: loop exit
PB: predicated region body
PF: predicated region fallthrough
CT: control target
= control target key end

     0   :  { %13 = vsyncpa [#allocation3], 0  ;;  %s1542_s0 = inlined_call_operand.hbm [shape: bf16[16,128], index: 0, kind: input, shape index: {}]   ;;  %s1543_s1 = inlined_call_operand.hbm [shape: bf16[16,128], index: 1, kind: input, shape index: {}]   ;;  %s1544_s2 = inlined_call_operand.hbm [shape: bf16[128,128], index: 2, kind: input, shape index: {}]   ;;  %s1545_s3 = inlined_call_operand.hbm [shape: bf16[128,128], index: 3, kind: input, shape index: {}]   ;;  %s1546_s4 = inlined_call_operand.hbm [shape: bf16[256,128], index: 4, kind: input, shape index: {}]   ;;  %s1547_s5 = inlined_call_operand.hbm [shape: bf16[256,128], index: 5, kind: input, shape index: {}]   ;;  %s1548_s6 = inlined_call_operand.hbm [shape: bf16[256,128], index: 6, kind: input, shape index: {}]   ;;  %s1549_s7 = inlined_call_operand.hbm [shape: f32[5,128], index: 7, kind: input, shape index: {}]   ;;  %s1550_s8 = inlined_call_operand.hbm [shape: f32[16,128], index: 8, kind: output, shape index: {}]  }
   0x1   :  { %14 = vsyncpa [#allocation6], 0 }
   0x2   :  { %15 = vsyncpa [#allocation9], 0 }
   0x3   :  { %16 = vsyncpa [#allocation12], 0 }
   0x4   :  { %17 = vsyncpa [#allocation15], 0 }
   0x5   :  { %18 = vsyncpa [#allocation4], 0  ;;  %s36_s29 = sshll.u32 %s1543_s1, 4  ;;  %s1429_s30 = smov [#allocation5]   ;;  %s37_s29 = int_to_ptr.hbm [resolvable:$true] %s36_s29 }
   0x6   :  { %s38_s9 = sshll.u32 %s1429_s30, 4  ;;  %s62_s12 = sshll.u32 %s1545_s3, 4  ;;  %s39_s9 = int_to_ptr.vmem [resolvable:$true] %s38_s9  ;;  %s63_s12 = int_to_ptr.hbm [resolvable:$true] %s62_s12 }
   0x7   :  { %s1430_s13 = smov 64   ;;  %s1431_s14 = smov 4  }
   0x8   :  { %44 = dma.hbm_to_vmem [thread:$0]  %s37_s29, 128, %s39_s9, [#allocation6], %s1430_s13, %s1430_s13, %s1431_s14  }
   0x9   :  { %s1432_s15 = smov [#allocation8]   ;;  %s88_s1 = sshll.u32 %s1547_s5, 4  ;;  %s89_s1 = int_to_ptr.hbm [resolvable:$true] %s88_s1 }
   0xa   :  { %s64_s16 = sshll.u32 %s1432_s15, 4  ;;  %s23_s20 = sshll.u32 %s1542_s0, 4  ;;  %s65_s16 = int_to_ptr.vmem [resolvable:$true] %s64_s16  ;;  %s24_s20 = int_to_ptr.hbm [resolvable:$true] %s23_s20 }
   0xb   :  { %70 = dma.hbm_to_vmem [thread:$0]  %s63_s12, 1024, %s65_s16, [#allocation9], %s1430_s13, %s1430_s13, %s1431_s14  }
   0xc   :  { %s1433_s21 = smov [#allocation11]   ;;  %s1434_s23 = smov [#allocation2]  }
   0xd   :  { %s90_s22 = sshll.u32 %s1433_s21, 4  ;;  %s25_s5 = sshll.u32 %s1434_s23, 4  ;;  %s91_s22 = int_to_ptr.vmem [resolvable:$true] %s90_s22  ;;  %s26_s5 = int_to_ptr.vmem [resolvable:$true] %s25_s5 }
   0xe   :  { %96 = dma.hbm_to_vmem [thread:$0]  %s89_s1, 2048, %s91_s22, [#allocation12], %s1430_s13, %s1430_s13, %s1431_s14  }
   0xf   :  { %s49_s26 = sshll.u32 %s1544_s2, 4  ;;  %s75_s28 = sshll.u32 %s1546_s4, 4  ;;  %s50_s26 = int_to_ptr.hbm [resolvable:$true] %s49_s26  ;;  %s76_s28 = int_to_ptr.hbm [resolvable:$true] %s75_s28 }
  0x10   :  { %31 = dma.hbm_to_vmem [thread:$0]  %s24_s20, 128, %s26_s5, [#allocation3], %s1430_s13, %s1430_s13, %s1431_s14  }
  0x11   :  { %s1435_s29 = smov [#allocation7]   ;;  %s1436_s9 = smov [#allocation10]  }
  0x12   :  { %s51_s30 = sshll.u32 %s1435_s29, 4  ;;  %s77_s2 = sshll.u32 %s1436_s9, 4  ;;  %s52_s30 = int_to_ptr.vmem [resolvable:$true] %s51_s30  ;;  %s78_s2 = int_to_ptr.vmem [resolvable:$true] %s77_s2 }
  0x13   :  { %57 = dma.hbm_to_vmem [thread:$0]  %s50_s26, 1024, %s52_s30, [#allocation6], %s1430_s13, %s1430_s13, %s1431_s14  }
  0x14   :  { %s101_s12 = sshll.u32 %s1548_s6, 4  ;;  %s115_s16 = sshll.u32 %s1549_s7, 4  ;;  %s102_s12 = int_to_ptr.hbm [resolvable:$true] %s101_s12  ;;  %s116_s16 = int_to_ptr.hbm [resolvable:$true] %s115_s16 }
  0x15   :  { %83 = dma.hbm_to_vmem [thread:$0]  %s76_s28, 2048, %s78_s2, [#allocation9], %s1430_s13, %s1430_s13, %s1431_s14  }
  0x16   :  { %s1437_s17 = smov [#allocation13]   ;;  %s1438_s1 = smov [#allocation14]  }
  0x17   :  { %s103_s18 = sshll.u32 %s1437_s17, 4  ;;  %s117_s6 = sshll.u32 %s1438_s1, 4  ;;  %s104_s18 = int_to_ptr.vmem [resolvable:$true] %s103_s18  ;;  %s118_s6 = int_to_ptr.vmem [resolvable:$true] %s117_s6 }
  0x18   :  { %109 = dma.hbm_to_vmem [thread:$0]  %s102_s12, 2048, %s104_s18, [#allocation12], %s1430_s13, %s1430_s13, %s1431_s14  }
  0x19   :  { %120 = dma.hbm_to_vmem [thread:$0]  %s116_s16, 128, %s118_s6, [#allocation15]  }
  0x1a   :  { %1417 = dma.done.wait [#allocation3], 128  }
  0x1b   :  { %1418 = vsyncadd [#allocation3], 4294967168 }
  0x1c   :  { %1419 = dma.done.wait [#allocation6], 1152  }
  0x1d   :  { %1420 = vsyncadd [#allocation6], 4294966144 }
  0x1e   :  { %1421 = dma.done.wait [#allocation9], 3072  }
  0x1f   :  { %1422 = vsyncadd [#allocation9], 4294964224 }
  0x20   :  { %1423 = dma.done.wait [#allocation12], 4096  }
  0x21   :  { %1424 = vsyncadd [#allocation12], 4294963200 }
  0x22   :  { %1425 = dma.done.wait [#allocation15], 128  }
  0x23   :  { %1426 = vsyncadd [#allocation15], 4294967168  ;;  %v1130_v0 = vld [vmem:[#allocation7 + $0x38] sm:$0xff]  ;;  %v1129_v2 = vld [vmem:[#allocation7 + $0x30] sm:$0xff]  ;;  %s1439_s7 = smov [#allocation16]   ;;  %s835_s19 = sshll.u32 %s1550_s8, 4  ;;  %s836_s19 = int_to_ptr.hbm [resolvable:$true] %s835_s19 }
  0x24   :  { %v1155_v1 = vld [vmem:[#allocation8 + $0x38] sm:$0xff]  ;;  %227 = vmatpush.bf16.msra.mxu0 %v1130_v0  ;;  %v1154_v3 = vld [vmem:[#allocation8 + $0x30] sm:$0xff]  ;;  %v1128_v4 = vld [vmem:[#allocation7 + $0x28] sm:$0xff]  ;;  %s833_s13 = sshll.u32 %s1439_s7, 4  ;;  %s1440_s20 = smov 128   ;;  %s834_s13 = int_to_ptr.vmem [resolvable:$true] %s833_s13 }
  0x25   :  { %354 = vmatpush.bf16.msra.mxu1 %v1155_v1  ;;  %v1153_v5 = vld [vmem:[#allocation8 + $0x28] sm:$0xff]  ;;  %v1163_v6 = vld [vmem:[#allocation10 + $0x78] sm:$0xff]  ;;  %v1162_v8 = vld [vmem:[#allocation10 + $0x70] sm:$0xff]  ;;  %s1441_s21 = smov 8  }
  0x26   :  { %v1138_v7 = vld [vmem:[#allocation10 + $0x38] sm:$0xff]  ;;  %455 = vmatpush.bf16.msra.mxu2 %v1163_v6  ;;  %v1137_v9 = vld [vmem:[#allocation10 + $0x30] sm:$0xff]  ;;  %v1127_v10 = vld [vmem:[#allocation7 + $0x20] sm:$0xff] }
  0x27   :  { %517 = vmatpush.bf16.msra.mxu3 %v1138_v7  ;;  %v1152_v11 = vld [vmem:[#allocation8 + $0x20] sm:$0xff]  ;;  %v1161_v12 = vld [vmem:[#allocation10 + $0x68] sm:$0xff]  ;;  %v1126_v14 = vld [vmem:[#allocation7 + $0x18] sm:$0xff] }
  0x28   :  { %228 = vmatpush.bf16.msra.mxu0 %v1129_v2  ;;  %v1136_v13 = vld [vmem:[#allocation10 + $0x28] sm:$0xff]  ;;  %v1151_v15 = vld [vmem:[#allocation8 + $0x18] sm:$0xff]  ;;  %v1160_v16 = vld [vmem:[#allocation10 + $0x60] sm:$0xff] }
  0x29   :  { %355 = vmatpush.bf16.msra.mxu1 %v1154_v3  ;;  %v1135_v17 = vld [vmem:[#allocation10 + $0x20] sm:$0xff]  ;;  %v1125_v18 = vld [vmem:[#allocation7 + $0x10] sm:$0xff]  ;;  %v1124_v20 = vld [vmem:[#allocation7 + $0x8] sm:$0xff] }
  0x2a   :  { %456 = vmatpush.bf16.msra.mxu2 %v1162_v8  ;;  %v1150_v19 = vld [vmem:[#allocation8 + $0x10] sm:$0xff]  ;;  %v1149_v21 = vld [vmem:[#allocation8 + $0x8] sm:$0xff]  ;;  %v1123_v22 = vld [vmem:[#allocation7] sm:$0xff] }
  0x2b   :  { %518 = vmatpush.bf16.msra.mxu3 %v1137_v9  ;;  %v1148_v23 = vld [vmem:[#allocation8] sm:$0xff]  ;;  %v1171_v24 = vld [vmem:[#allocation11 + $0x78] sm:$0xff]  ;;  %v1122_v26 = vld [vmem:[#allocation2] sm:$0xff] }
  0x2c   :  { %229 = vmatpush.bf16.msra.mxu0 %v1128_v4  ;;  %v1146_v25 = vld [vmem:[#allocation11 + $0x38] sm:$0xff]  ;;  %v1170_v28 = vld [vmem:[#allocation11 + $0x70] sm:$0xff]  ;;  %v1169_v30 = vld [vmem:[#allocation11 + $0x68] sm:$0xff] }
  0x2d   :  { %356 = vmatpush.bf16.msra.mxu1 %v1153_v5  ;;  %v1147_v27 = vld [vmem:[#allocation5] sm:$0xff]  ;;  %v1145_v29 = vld [vmem:[#allocation11 + $0x30] sm:$0xff]  ;;  %v1144_v31 = vld [vmem:[#allocation11 + $0x28] sm:$0xff] }
  0x2e   :  { %457 = vmatpush.bf16.msra.mxu2 %v1161_v12  ;;  %v1168_v32 = vld [vmem:[#allocation11 + $0x60] sm:$0xff]  ;;  %v1167_v34 = vld [vmem:[#allocation11 + $0x58] sm:$0xff]  ;;  %v1166_v38 = vld [vmem:[#allocation11 + $0x50] sm:$0xff] }
  0x2f   :  { %519 = vmatpush.bf16.msra.mxu3 %v1136_v13  ;;  %v1143_v33 = vld [vmem:[#allocation11 + $0x20] sm:$0xff]  ;;  %v1142_v35 = vld [vmem:[#allocation11 + $0x18] sm:$0xff]  ;;  %v1141_v39 = vld [vmem:[#allocation11 + $0x10] sm:$0xff] }
  0x30   :  { %230 = vmatpush.bf16.msra.mxu0 %v1127_v10  ;;  %v1159_v36 = vld [vmem:[#allocation10 + $0x58] sm:$0xff]  ;;  %v1158_v40 = vld [vmem:[#allocation10 + $0x50] sm:$0xff]  ;;  %v1165_v42 = vld [vmem:[#allocation11 + $0x48] sm:$0xff] }
  0x31   :  { %357 = vmatpush.bf16.msra.mxu1 %v1152_v11  ;;  %v1134_v37 = vld [vmem:[#allocation10 + $0x18] sm:$0xff]  ;;  %v1133_v41 = vld [vmem:[#allocation10 + $0x10] sm:$0xff]  ;;  %v1140_v43 = vld [vmem:[#allocation11 + $0x8] sm:$0xff] }
  0x32   :  { %458 = vmatpush.bf16.msra.mxu2 %v1160_v16  ;;  %v1157_v44 = vld [vmem:[#allocation10 + $0x48] sm:$0xff]  ;;  %v1164_v46 = vld [vmem:[#allocation11 + $0x40] sm:$0xff]  ;;  %v1187_v50 = vld [vmem:[#allocation13 + $0x78] sm:$0xff] }
  0x33   :  { %520 = vmatpush.bf16.msra.mxu3 %v1135_v17  ;;  %v1132_v45 = vld [vmem:[#allocation10 + $0x8] sm:$0xff]  ;;  %v1139_v47 = vld [vmem:[#allocation11] sm:$0xff]  ;;  %v1179_v51 = vld [vmem:[#allocation13 + $0x38] sm:$0xff] }
  0x34   :  { %231 = vmatpush.bf16.msra.mxu0 %v1126_v14  ;;  %v1156_v48 = vld [vmem:[#allocation10 + $0x40] sm:$0xff]  ;;  %v1186_v52 = vld [vmem:[#allocation13 + $0x70] sm:$0xff]  ;;  %v1185_v54 = vld [vmem:[#allocation13 + $0x68] sm:$0xff] }
  0x35   :  { %358 = vmatpush.bf16.msra.mxu1 %v1151_v15  ;;  %v1131_v49 = vld [vmem:[#allocation10] sm:$0xff]  ;;  %v1178_v53 = vld [vmem:[#allocation13 + $0x30] sm:$0xff]  ;;  %v1183_v9 = vld [vmem:[#allocation13 + $0x58] sm:$0xff] }
  0x36   :  { %459 = vmatpush.bf16.msra.mxu2 %v1159_v36  ;;  %v1184_v55 = vld [vmem:[#allocation13 + $0x60] sm:$0xff]  ;;  %v1177_v10 = vld [vmem:[#allocation13 + $0x28] sm:$0xff]  ;;  %v1182_v11 = vld [vmem:[#allocation13 + $0x50] sm:$0xff] }
  0x37   :  { %521 = vmatpush.bf16.msra.mxu3 %v1134_v37  ;;  %v1532_v56 = vld [vmem:[#allocation14] sm:$0x1f]  ;;  %v1181_v13 = vld [vmem:[#allocation13 + $0x48] sm:$0xff]  ;;  %v1175_v14 = vld [vmem:[#allocation13 + $0x18] sm:$0xff] }
  0x38   :  { %232 = vmatpush.bf16.msra.mxu0 %v1125_v18  ;;  %v299_v59 = vperm.slane %v1532_v56, 1  ;;  %v172_v60 = vperm.slane %v1532_v56, 0  ;;  %v1176_v12 = vld [vmem:[#allocation13 + $0x20] sm:$0xff]  ;;  %v1174_v16 = vld [vmem:[#allocation13 + $0x10] sm:$0xff]  ;;  %v1173_v17 = vld [vmem:[#allocation13 + $0x8] sm:$0xff] }
  0x39   :  { %359 = vmatpush.bf16.msra.mxu1 %v1150_v19  ;;  %v1180_v15 = vld [vmem:[#allocation13 + $0x40] sm:$0xff] }
  0x3a   :  { %460 = vmatpush.bf16.msra.mxu2 %v1158_v40  ;;  %v1172_v18 = vld [vmem:[#allocation13] sm:$0xff] }
  0x3b   :  { %522 = vmatpush.bf16.msra.mxu3 %v1133_v41 }
  0x3c   :  { %233 = vmatpush.bf16.msra.mxu0 %v1124_v20 }
  0x3d   :  { %360 = vmatpush.bf16.msra.mxu1 %v1149_v21 }
  0x3e   :  { %461 = vmatpush.bf16.msra.mxu2 %v1157_v44  ;;  %v824_v44 = vperm.slane %v1532_v56, 4 }
  0x3f   :  { %523 = vmatpush.bf16.msra.mxu3 %v1132_v45 }
  0x40   :  { %234 = vmatpush.bf16.msra.mxu0 %v1123_v22  ;;  %v662_v22 = vperm.slane %v1532_v56, 3 }
  0x41   :  { %361 = vmatpush.bf16.msra.mxu1 %v1148_v23 }
  0x42   :  { %462 = vmatpush.bf16.msra.mxu2 %v1156_v48 }
  0x43   :  { %235 = vmatmul.bf16.vlgmr.msra.gmra.mxu0 %v1122_v26  ;;  %524 = vmatpush.bf16.msra.mxu3 %v1131_v49 }
  0x44   :  { %580 = vmatpush.bf16.msrb.mxu0 %v1171_v24  ;;  %362 = vmatmul.bf16.vlgmr.msra.gmra.mxu1 %v1147_v27 }
  0x45   :  { %642 = vmatpush.bf16.msrb.mxu1 %v1146_v25 }
  0x46   :  { %748 = vmatpush.bf16.msrb.mxu2 %v1187_v50 }
  0x47   :  { %810 = vmatpush.bf16.msrb.mxu3 %v1179_v51 }
  0x48   :  { %581 = vmatpush.bf16.msrb.mxu0 %v1170_v28 }
  0x49   :  { %643 = vmatpush.bf16.msrb.mxu1 %v1145_v29 }
  0x4a   :  { %749 = vmatpush.bf16.msrb.mxu2 %v1186_v52 }
  0x4b   :  { %811 = vmatpush.bf16.msrb.mxu3 %v1178_v53 }
  0x4c   :  { %582 = vmatpush.bf16.msrb.mxu0 %v1169_v30 }
  0x4d   :  { %644 = vmatpush.bf16.msrb.mxu1 %v1144_v31 }
  0x4e   :  { %750 = vmatpush.bf16.msrb.mxu2 %v1185_v54 }
  0x4f   :  { %812 = vmatpush.bf16.msrb.mxu3 %v1177_v10 }
  0x50   :  { %583 = vmatpush.bf16.msrb.mxu0 %v1168_v32  ;;  %v656_v32 = vperm.slane %v1532_v56, 2 }
  0x51   :  { %645 = vmatpush.bf16.msrb.mxu1 %v1143_v33 }
  0x52   :  { %751 = vmatpush.bf16.msrb.mxu2 %v1184_v55 }
  0x53   :  { %813 = vmatpush.bf16.msrb.mxu3 %v1176_v12 }
  0x54   :  { %584 = vmatpush.bf16.msrb.mxu0 %v1167_v34 }
  0x55   :  { %646 = vmatpush.bf16.msrb.mxu1 %v1142_v35 }
  0x56   :  { %752 = vmatpush.bf16.msrb.mxu2 %v1183_v9 }
  0x57   :  { %814 = vmatpush.bf16.msrb.mxu3 %v1175_v14 }
  0x58   :  { %585 = vmatpush.bf16.msrb.mxu0 %v1166_v38 }
  0x59   :  { %647 = vmatpush.bf16.msrb.mxu1 %v1141_v39 }
  0x5a   :  { %753 = vmatpush.bf16.msrb.mxu2 %v1182_v11 }
  0x5b   :  { %815 = vmatpush.bf16.msrb.mxu3 %v1174_v16 }
  0x5c   :  { %586 = vmatpush.bf16.msrb.mxu0 %v1165_v42 }
  0x5d   :  { %648 = vmatpush.bf16.msrb.mxu1 %v1140_v43 }
  0x5e   :  { %754 = vmatpush.bf16.msrb.mxu2 %v1181_v13 }
  0x5f   :  { %816 = vmatpush.bf16.msrb.mxu3 %v1173_v17 }
  0x60   :  { %587 = vmatpush.bf16.msrb.mxu0 %v1164_v46 }
  0x61   :  { %649 = vmatpush.bf16.msrb.mxu1 %v1139_v47 }
  0x62   :  { %755 = vmatpush.bf16.msrb.mxu2 %v1180_v15 }
  0x63   :  { %817 = vmatpush.bf16.msrb.mxu3 %v1172_v18 }
  0xc0   :  { %v236_v57 = vpop.f32.mrf.mxu0 }
  0xc1   :  { %v363_v58 = vpop.f32.mrf.mxu1  ;;  %v237_v62 = vadd.f32 %v236_v57, %v172_v60 }
  0xc2   :  { %v364_v61 = vadd.f32 %v363_v58, %v299_v59 }
  0xc3   :  { %v241_v4 = vand.u32 2147483647, %v237_v62 }
  0xc4   :  { %v368_v1 = vand.u32 2147483647, %v364_v61 }
  0xc5   :  { %vm243_vm4 = vcmp.ge.f32.partialorder %v241_v4, 0.05 }
  0xc6   :  { %vm370_vm0 = vcmp.ge.f32.partialorder %v368_v1, 0.05 }
  0xc8   :  { %v238_v63 = vpop.f32.mrf.mxu0 }
  0xc9   :  { %v365_v0 = vpop.f32.mrf.mxu1  ;;  %v239_v2 = vadd.f32 %v238_v63, %v172_v60 }
  0xca   :  { %v366_v3 = vadd.f32 %v365_v0, %v299_v59 }
  0xcb   :  { %v242_v5 = vand.u32 2147483647, %v239_v2  ;;  %v280_v6 = vpack.c.bf16 %v239_v2, %v237_v62 }
  0xcc   :  { %v369_v7 = vand.u32 2147483647, %v366_v3  ;;  %v957_v8 = vpack.c.bf16 %v366_v3, %v364_v61 }
  0xcd   :  { %650 = vmatmul.bf16.vlgmr.msrb.gmra.mxu1 %v280_v6  ;;  %vm244_vm2 = vcmp.ge.f32.partialorder %v242_v5, 0.05 }
  0xce   :  { %588 = vmatmul.bf16.vlgmr.msrb.gmra.mxu0 %v957_v8  ;;  %vm371_vm1 = vcmp.ge.f32.partialorder %v369_v7, 0.05  ;;  %vm991_vm5 = vmpackc.low %vm244_vm2, %vm243_vm4 }
  0xcf   :  { %vm956_vm3 = vmpackc.low %vm371_vm1, %vm370_vm0  ;;  %993 = vmatmul.msk.bf16.vlgmr.msra.gmra.mxu3 %vm991_vm5, %v280_v6 }
  0xd0   :  { %958 = vmatmul.msk.bf16.vlgmr.msra.gmra.mxu2 %vm956_vm3, %v957_v8 }
 0x14a   :  { %v651_v20 = vpop.f32.mrf.mxu1 }
 0x14b   :  { %v589_v19 = vpop.f32.mrf.mxu0 }
 0x14c   :  { %v652_v21 = vadd.f32 %v651_v20, %v589_v19 }
 0x14e   :  { %v663_v27 = vadd.f32 %v662_v22, %v652_v21 }
 0x150   :  { %v665_v30 = vmax.f32 %v663_v27, 0.0 }
 0x152   :  { %v526_v25 = vpop.f32.mrf.mxu3  ;;  %v653_v26 = vpop.f32.mrf.mxu1 }
 0x153   :  { %v464_v23 = vpop.f32.mrf.mxu2  ;;  %v591_v24 = vpop.f32.mrf.mxu0 }
 0x154   :  { %v654_v28 = vadd.f32 %v653_v26, %v591_v24  ;;  %v527_v31 = vadd.f32 %v526_v25, %v464_v23 }
 0x156   :  { %v664_v29 = vadd.f32 %v662_v22, %v654_v28  ;;  %v657_v37 = vadd.f32 %v656_v32, %v527_v31 }
 0x158   :  { %v666_v33 = vmax.f32 %v664_v29, 0.0  ;;  %v659_v40 = vmax.f32 %v657_v37, 0.0 }
 0x15a   :  { %v667_v35 = vpack.c.bf16 %v666_v33, %v665_v30  ;;  %v528_v36 = vpop.f32.mrf.mxu3 }
 0x15b   :  { %v466_v34 = vpop.f32.mrf.mxu2 }
 0x15c   :  { %v529_v38 = vadd.f32 %v528_v36, %v466_v34  ;;  %756 = vmatmul.bf16.vlgmr.msrb.gmra.mxu2 %v667_v35 }
 0x15e   :  { %v658_v39 = vadd.f32 %v656_v32, %v529_v38 }
 0x160   :  { %v660_v41 = vmax.f32 %v658_v39, 0.0 }
 0x162   :  { %v661_v42 = vpack.c.bf16 %v660_v41, %v659_v40 }
 0x164   :  { %818 = vmatmul.bf16.vlgmr.msrb.gmra.mxu3 %v661_v42 }
 0x1df   :  { %v757_v43 = vpop.f32.mrf.mxu2 }
 0x1e7   :  { %v819_v45 = vpop.f32.mrf.mxu3  ;;  %v759_v48 = vpop.f32.mrf.mxu2 }
 0x1e8   :  { %v820_v46 = vadd.f32 %v819_v45, %v757_v43 }
 0x1ea   :  { %v825_v47 = vadd.f32 %v824_v44, %v820_v46 }
 0x1ec   :  { %827 = vst [vmem:[#allocation16] sm:$0xff] %v825_v47 }
 0x1ef   :  { %v821_v49 = vpop.f32.mrf.mxu3 }
 0x1f0   :  { %v822_v50 = vadd.f32 %v821_v49, %v759_v48 }
 0x1f2   :  { %v826_v51 = vadd.f32 %v824_v44, %v822_v50 }
 0x1f4   :  { %828 = vst [vmem:[#allocation16 + $0x8] sm:$0xff] %v826_v51 }
 0x1f5   :  { %841 = dma.vmem_to_hbm [thread:$0]  %s834_s13, 256, %s836_s19, [#allocation4], %s1440_s20, %s1440_s20, %s1441_s21  }
 0x1f6   :  { %1427 = dma.done.wait [#allocation4], 256  }
 0x1f7   :  { %1428 = vsyncadd [#allocation4], 4294967040 }
 0x1f8   :  { %846 = vsyncpa [#allocation3], 1 }
 0x1f9   :  { %847 = vsyncpa [#allocation6], 1 }
 0x1fa   :  { %848 = vsyncpa [#allocation9], 1 }
 0x1fb   :  { %849 = vsyncpa [#allocation12], 1 }
 0x1fc   :  { %850 = vsyncpa [#allocation15], 1 }
 0x1fd   :  { %851 = vsyncpa [#allocation4], 1 }

// kernel: tpu_custom_call.1
= control target key start
LH: loop header
LB: loop body
LE: loop exit
PB: predicated region body
PF: predicated region fallthrough
CT: control target
= control target key end

     0   :  { %13 = vsyncpa [#allocation3], 0  ;;  %s1542_s0 = inlined_call_operand.hbm [shape: bf16[16,128], index: 0, kind: input, shape index: {}]   ;;  %s1543_s1 = inlined_call_operand.hbm [shape: bf16[16,128], index: 1, kind: input, shape index: {}]   ;;  %s1544_s2 = inlined_call_operand.hbm [shape: bf16[128,128], index: 2, kind: input, shape index: {}]   ;;  %s1545_s3 = inlined_call_operand.hbm [shape: bf16[128,128], index: 3, kind: input, shape index: {}]   ;;  %s1546_s4 = inlined_call_operand.hbm [shape: bf16[256,128], index: 4, kind: input, shape index: {}]   ;;  %s1547_s5 = inlined_call_operand.hbm [shape: bf16[256,128], index: 5, kind: input, shape index: {}]   ;;  %s1548_s6 = inlined_call_operand.hbm [shape: bf16[256,128], index: 6, kind: input, shape index: {}]   ;;  %s1549_s7 = inlined_call_operand.hbm [shape: f32[5,128], index: 7, kind: input, shape index: {}]   ;;  %s1550_s8 = inlined_call_operand.hbm [shape: f32[16,128], index: 8, kind: output, shape index: {}]  }
   0x1   :  { %14 = vsyncpa [#allocation6], 0 }
   0x2   :  { %15 = vsyncpa [#allocation9], 0 }
   0x3   :  { %16 = vsyncpa [#allocation12], 0 }
   0x4   :  { %17 = vsyncpa [#allocation15], 0 }
   0x5   :  { %18 = vsyncpa [#allocation4], 0  ;;  %s36_s29 = sshll.u32 %s1543_s1, 4  ;;  %s1429_s30 = smov [#allocation5]   ;;  %s37_s29 = int_to_ptr.hbm [resolvable:$true] %s36_s29 }
   0x6   :  { %s38_s9 = sshll.u32 %s1429_s30, 4  ;;  %s62_s12 = sshll.u32 %s1545_s3, 4  ;;  %s39_s9 = int_to_ptr.vmem [resolvable:$true] %s38_s9  ;;  %s63_s12 = int_to_ptr.hbm [resolvable:$true] %s62_s12 }
   0x7   :  { %s1430_s13 = smov 64   ;;  %s1431_s14 = smov 4  }
   0x8   :  { %44 = dma.hbm_to_vmem [thread:$0]  %s37_s29, 128, %s39_s9, [#allocation6], %s1430_s13, %s1430_s13, %s1431_s14  }
   0x9   :  { %s1432_s15 = smov [#allocation8]   ;;  %s88_s1 = sshll.u32 %s1547_s5, 4  ;;  %s89_s1 = int_to_ptr.hbm [resolvable:$true] %s88_s1 }
   0xa   :  { %s64_s16 = sshll.u32 %s1432_s15, 4  ;;  %s23_s20 = sshll.u32 %s1542_s0, 4  ;;  %s65_s16 = int_to_ptr.vmem [resolvable:$true] %s64_s16  ;;  %s24_s20 = int_to_ptr.hbm [resolvable:$true] %s23_s20 }
   0xb   :  { %70 = dma.hbm_to_vmem [thread:$0]  %s63_s12, 1024, %s65_s16, [#allocation9], %s1430_s13, %s1430_s13, %s1431_s14  }
   0xc   :  { %s1433_s21 = smov [#allocation11]   ;;  %s1434_s23 = smov [#allocation2]  }
   0xd   :  { %s90_s22 = sshll.u32 %s1433_s21, 4  ;;  %s25_s5 = sshll.u32 %s1434_s23, 4  ;;  %s91_s22 = int_to_ptr.vmem [resolvable:$true] %s90_s22  ;;  %s26_s5 = int_to_ptr.vmem [resolvable:$true] %s25_s5 }
   0xe   :  { %96 = dma.hbm_to_vmem [thread:$0]  %s89_s1, 2048, %s91_s22, [#allocation12], %s1430_s13, %s1430_s13, %s1431_s14  }
   0xf   :  { %s49_s26 = sshll.u32 %s1544_s2, 4  ;;  %s75_s28 = sshll.u32 %s1546_s4, 4  ;;  %s50_s26 = int_to_ptr.hbm [resolvable:$true] %s49_s26  ;;  %s76_s28 = int_to_ptr.hbm [resolvable:$true] %s75_s28 }
  0x10   :  { %31 = dma.hbm_to_vmem [thread:$0]  %s24_s20, 128, %s26_s5, [#allocation3], %s1430_s13, %s1430_s13, %s1431_s14  }
  0x11   :  { %s1435_s29 = smov [#allocation7]   ;;  %s1436_s9 = smov [#allocation10]  }
  0x12   :  { %s51_s30 = sshll.u32 %s1435_s29, 4  ;;  %s77_s2 = sshll.u32 %s1436_s9, 4  ;;  %s52_s30 = int_to_ptr.vmem [resolvable:$true] %s51_s30  ;;  %s78_s2 = int_to_ptr.vmem [resolvable:$true] %s77_s2 }
  0x13   :  { %57 = dma.hbm_to_vmem [thread:$0]  %s50_s26, 1024, %s52_s30, [#allocation6], %s1430_s13, %s1430_s13, %s1431_s14  }
  0x14   :  { %s101_s12 = sshll.u32 %s1548_s6, 4  ;;  %s115_s16 = sshll.u32 %s1549_s7, 4  ;;  %s102_s12 = int_to_ptr.hbm [resolvable:$true] %s101_s12  ;;  %s116_s16 = int_to_ptr.hbm [resolvable:$true] %s115_s16 }
  0x15   :  { %83 = dma.hbm_to_vmem [thread:$0]  %s76_s28, 2048, %s78_s2, [#allocation9], %s1430_s13, %s1430_s13, %s1431_s14  }
  0x16   :  { %s1437_s17 = smov [#allocation13]   ;;  %s1438_s1 = smov [#allocation14]  }
  0x17   :  { %s103_s18 = sshll.u32 %s1437_s17, 4  ;;  %s117_s6 = sshll.u32 %s1438_s1, 4  ;;  %s104_s18 = int_to_ptr.vmem [resolvable:$true] %s103_s18  ;;  %s118_s6 = int_to_ptr.vmem [resolvable:$true] %s117_s6 }
  0x18   :  { %109 = dma.hbm_to_vmem [thread:$0]  %s102_s12, 2048, %s104_s18, [#allocation12], %s1430_s13, %s1430_s13, %s1431_s14  }
  0x19   :  { %120 = dma.hbm_to_vmem [thread:$0]  %s116_s16, 128, %s118_s6, [#allocation15]  }
  0x1a   :  { %1417 = dma.done.wait [#allocation3], 128  }
  0x1b   :  { %1418 = vsyncadd [#allocation3], 4294967168 }
  0x1c   :  { %1419 = dma.done.wait [#allocation6], 1152  }
  0x1d   :  { %1420 = vsyncadd [#allocation6], 4294966144 }
  0x1e   :  { %1421 = dma.done.wait [#allocation9], 3072  }
  0x1f   :  { %1422 = vsyncadd [#allocation9], 4294964224 }
  0x20   :  { %1423 = dma.done.wait [#allocation12], 4096  }
  0x21   :  { %1424 = vsyncadd [#allocation12], 4294963200 }
  0x22   :  { %1425 = dma.done.wait [#allocation15], 128  }
  0x23   :  { %1426 = vsyncadd [#allocation15], 4294967168  ;;  %v1130_v0 = vld [vmem:[#allocation7 + $0x38] sm:$0xff]  ;;  %v1129_v2 = vld [vmem:[#allocation7 + $0x30] sm:$0xff]  ;;  %s1439_s7 = smov [#allocation16]   ;;  %s835_s19 = sshll.u32 %s1550_s8, 4  ;;  %s836_s19 = int_to_ptr.hbm [resolvable:$true] %s835_s19 }
  0x24   :  { %v1155_v1 = vld [vmem:[#allocation8 + $0x38] sm:$0xff]  ;;  %227 = vmatpush.bf16.msra.mxu0 %v1130_v0  ;;  %v1154_v3 = vld [vmem:[#allocation8 + $0x30] sm:$0xff]  ;;  %v1128_v4 = vld [vmem:[#allocation7 + $0x28] sm:$0xff]  ;;  %s833_s13 = sshll.u32 %s1439_s7, 4  ;;  %s1440_s20 = smov 128   ;;  %s834_s13 = int_to_ptr.vmem [resolvable:$true] %s833_s13 }
  0x25   :  { %354 = vmatpush.bf16.msra.mxu1 %v1155_v1  ;;  %v1153_v5 = vld [vmem:[#allocation8 + $0x28] sm:$0xff]  ;;  %v1163_v6 = vld [vmem:[#allocation10 + $0x78] sm:$0xff]  ;;  %v1162_v8 = vld [vmem:[#allocation10 + $0x70] sm:$0xff]  ;;  %s1441_s21 = smov 8  }
  0x26   :  { %v1138_v7 = vld [vmem:[#allocation10 + $0x38] sm:$0xff]  ;;  %455 = vmatpush.bf16.msra.mxu2 %v1163_v6  ;;  %v1137_v9 = vld [vmem:[#allocation10 + $0x30] sm:$0xff]  ;;  %v1127_v10 = vld [vmem:[#allocation7 + $0x20] sm:$0xff] }
  0x27   :  { %517 = vmatpush.bf16.msra.mxu3 %v1138_v7  ;;  %v1152_v11 = vld [vmem:[#allocation8 + $0x20] sm:$0xff]  ;;  %v1161_v12 = vld [vmem:[#allocation10 + $0x68] sm:$0xff]  ;;  %v1126_v14 = vld [vmem:[#allocation7 + $0x18] sm:$0xff] }
  0x28   :  { %228 = vmatpush.bf16.msra.mxu0 %v1129_v2  ;;  %v1136_v13 = vld [vmem:[#allocation10 + $0x28] sm:$0xff]  ;;  %v1151_v15 = vld [vmem:[#allocation8 + $0x18] sm:$0xff]  ;;  %v1160_v16 = vld [vmem:[#allocation10 + $0x60] sm:$0xff] }
  0x29   :  { %355 = vmatpush.bf16.msra.mxu1 %v1154_v3  ;;  %v1135_v17 = vld [vmem:[#allocation10 + $0x20] sm:$0xff]  ;;  %v1125_v18 = vld [vmem:[#allocation7 + $0x10] sm:$0xff]  ;;  %v1124_v20 = vld [vmem:[#allocation7 + $0x8] sm:$0xff] }
  0x2a   :  { %456 = vmatpush.bf16.msra.mxu2 %v1162_v8  ;;  %v1150_v19 = vld [vmem:[#allocation8 + $0x10] sm:$0xff]  ;;  %v1149_v21 = vld [vmem:[#allocation8 + $0x8] sm:$0xff]  ;;  %v1123_v22 = vld [vmem:[#allocation7] sm:$0xff] }
  0x2b   :  { %518 = vmatpush.bf16.msra.mxu3 %v1137_v9  ;;  %v1148_v23 = vld [vmem:[#allocation8] sm:$0xff]  ;;  %v1171_v24 = vld [vmem:[#allocation11 + $0x78] sm:$0xff]  ;;  %v1122_v26 = vld [vmem:[#allocation2] sm:$0xff] }
  0x2c   :  { %229 = vmatpush.bf16.msra.mxu0 %v1128_v4  ;;  %v1146_v25 = vld [vmem:[#allocation11 + $0x38] sm:$0xff]  ;;  %v1170_v28 = vld [vmem:[#allocation11 + $0x70] sm:$0xff]  ;;  %v1169_v30 = vld [vmem:[#allocation11 + $0x68] sm:$0xff] }
  0x2d   :  { %356 = vmatpush.bf16.msra.mxu1 %v1153_v5  ;;  %v1147_v27 = vld [vmem:[#allocation5] sm:$0xff]  ;;  %v1145_v29 = vld [vmem:[#allocation11 + $0x30] sm:$0xff]  ;;  %v1144_v31 = vld [vmem:[#allocation11 + $0x28] sm:$0xff] }
  0x2e   :  { %457 = vmatpush.bf16.msra.mxu2 %v1161_v12  ;;  %v1168_v32 = vld [vmem:[#allocation11 + $0x60] sm:$0xff]  ;;  %v1167_v34 = vld [vmem:[#allocation11 + $0x58] sm:$0xff]  ;;  %v1166_v38 = vld [vmem:[#allocation11 + $0x50] sm:$0xff] }
  0x2f   :  { %519 = vmatpush.bf16.msra.mxu3 %v1136_v13  ;;  %v1143_v33 = vld [vmem:[#allocation11 + $0x20] sm:$0xff]  ;;  %v1142_v35 = vld [vmem:[#allocation11 + $0x18] sm:$0xff]  ;;  %v1141_v39 = vld [vmem:[#allocation11 + $0x10] sm:$0xff] }
  0x30   :  { %230 = vmatpush.bf16.msra.mxu0 %v1127_v10  ;;  %v1159_v36 = vld [vmem:[#allocation10 + $0x58] sm:$0xff]  ;;  %v1158_v40 = vld [vmem:[#allocation10 + $0x50] sm:$0xff]  ;;  %v1165_v42 = vld [vmem:[#allocation11 + $0x48] sm:$0xff] }
  0x31   :  { %357 = vmatpush.bf16.msra.mxu1 %v1152_v11  ;;  %v1134_v37 = vld [vmem:[#allocation10 + $0x18] sm:$0xff]  ;;  %v1133_v41 = vld [vmem:[#allocation10 + $0x10] sm:$0xff]  ;;  %v1140_v43 = vld [vmem:[#allocation11 + $0x8] sm:$0xff] }
  0x32   :  { %458 = vmatpush.bf16.msra.mxu2 %v1160_v16  ;;  %v1157_v44 = vld [vmem:[#allocation10 + $0x48] sm:$0xff]  ;;  %v1164_v46 = vld [vmem:[#allocation11 + $0x40] sm:$0xff]  ;;  %v1187_v50 = vld [vmem:[#allocation13 + $0x78] sm:$0xff] }
  0x33   :  { %520 = vmatpush.bf16.msra.mxu3 %v1135_v17  ;;  %v1132_v45 = vld [vmem:[#allocation10 + $0x8] sm:$0xff]  ;;  %v1139_v47 = vld [vmem:[#allocation11] sm:$0xff]  ;;  %v1179_v51 = vld [vmem:[#allocation13 + $0x38] sm:$0xff] }
  0x34   :  { %231 = vmatpush.bf16.msra.mxu0 %v1126_v14  ;;  %v1156_v48 = vld [vmem:[#allocation10 + $0x40] sm:$0xff]  ;;  %v1186_v52 = vld [vmem:[#allocation13 + $0x70] sm:$0xff]  ;;  %v1185_v54 = vld [vmem:[#allocation13 + $0x68] sm:$0xff] }
  0x35   :  { %358 = vmatpush.bf16.msra.mxu1 %v1151_v15  ;;  %v1131_v49 = vld [vmem:[#allocation10] sm:$0xff]  ;;  %v1178_v53 = vld [vmem:[#allocation13 + $0x30] sm:$0xff]  ;;  %v1183_v9 = vld [vmem:[#allocation13 + $0x58] sm:$0xff] }
  0x36   :  { %459 = vmatpush.bf16.msra.mxu2 %v1159_v36  ;;  %v1184_v55 = vld [vmem:[#allocation13 + $0x60] sm:$0xff]  ;;  %v1177_v10 = vld [vmem:[#allocation13 + $0x28] sm:$0xff]  ;;  %v1182_v11 = vld [vmem:[#allocation13 + $0x50] sm:$0xff] }
  0x37   :  { %521 = vmatpush.bf16.msra.mxu3 %v1134_v37  ;;  %v1532_v56 = vld [vmem:[#allocation14] sm:$0x1f]  ;;  %v1181_v13 = vld [vmem:[#allocation13 + $0x48] sm:$0xff]  ;;  %v1175_v14 = vld [vmem:[#allocation13 + $0x18] sm:$0xff] }
  0x38   :  { %232 = vmatpush.bf16.msra.mxu0 %v1125_v18  ;;  %v299_v59 = vperm.slane %v1532_v56, 1  ;;  %v172_v60 = vperm.slane %v1532_v56, 0  ;;  %v1176_v12 = vld [vmem:[#allocation13 + $0x20] sm:$0xff]  ;;  %v1174_v16 = vld [vmem:[#allocation13 + $0x10] sm:$0xff]  ;;  %v1173_v17 = vld [vmem:[#allocation13 + $0x8] sm:$0xff] }
  0x39   :  { %359 = vmatpush.bf16.msra.mxu1 %v1150_v19  ;;  %v1180_v15 = vld [vmem:[#allocation13 + $0x40] sm:$0xff] }
  0x3a   :  { %460 = vmatpush.bf16.msra.mxu2 %v1158_v40  ;;  %v1172_v18 = vld [vmem:[#allocation13] sm:$0xff] }
  0x3b   :  { %522 = vmatpush.bf16.msra.mxu3 %v1133_v41 }
  0x3c   :  { %233 = vmatpush.bf16.msra.mxu0 %v1124_v20 }
  0x3d   :  { %360 = vmatpush.bf16.msra.mxu1 %v1149_v21 }
  0x3e   :  { %461 = vmatpush.bf16.msra.mxu2 %v1157_v44  ;;  %v824_v44 = vperm.slane %v1532_v56, 4 }
  0x3f   :  { %523 = vmatpush.bf16.msra.mxu3 %v1132_v45 }
  0x40   :  { %234 = vmatpush.bf16.msra.mxu0 %v1123_v22  ;;  %v662_v22 = vperm.slane %v1532_v56, 3 }
  0x41   :  { %361 = vmatpush.bf16.msra.mxu1 %v1148_v23 }
  0x42   :  { %462 = vmatpush.bf16.msra.mxu2 %v1156_v48 }
  0x43   :  { %235 = vmatmul.bf16.vlgmr.msra.gmra.mxu0 %v1122_v26  ;;  %524 = vmatpush.bf16.msra.mxu3 %v1131_v49 }
  0x44   :  { %580 = vmatpush.bf16.msrb.mxu0 %v1171_v24  ;;  %362 = vmatmul.bf16.vlgmr.msra.gmra.mxu1 %v1147_v27 }
  0x45   :  { %642 = vmatpush.bf16.msrb.mxu1 %v1146_v25 }
  0x46   :  { %748 = vmatpush.bf16.msrb.mxu2 %v1187_v50 }
  0x47   :  { %810 = vmatpush.bf16.msrb.mxu3 %v1179_v51 }
  0x48   :  { %581 = vmatpush.bf16.msrb.mxu0 %v1170_v28 }
  0x49   :  { %643 = vmatpush.bf16.msrb.mxu1 %v1145_v29 }
  0x4a   :  { %749 = vmatpush.bf16.msrb.mxu2 %v1186_v52 }
  0x4b   :  { %811 = vmatpush.bf16.msrb.mxu3 %v1178_v53 }
  0x4c   :  { %582 = vmatpush.bf16.msrb.mxu0 %v1169_v30 }
  0x4d   :  { %644 = vmatpush.bf16.msrb.mxu1 %v1144_v31 }
  0x4e   :  { %750 = vmatpush.bf16.msrb.mxu2 %v1185_v54 }
  0x4f   :  { %812 = vmatpush.bf16.msrb.mxu3 %v1177_v10 }
  0x50   :  { %583 = vmatpush.bf16.msrb.mxu0 %v1168_v32  ;;  %v656_v32 = vperm.slane %v1532_v56, 2 }
  0x51   :  { %645 = vmatpush.bf16.msrb.mxu1 %v1143_v33 }
  0x52   :  { %751 = vmatpush.bf16.msrb.mxu2 %v1184_v55 }
  0x53   :  { %813 = vmatpush.bf16.msrb.mxu3 %v1176_v12 }
  0x54   :  { %584 = vmatpush.bf16.msrb.mxu0 %v1167_v34 }
  0x55   :  { %646 = vmatpush.bf16.msrb.mxu1 %v1142_v35 }
  0x56   :  { %752 = vmatpush.bf16.msrb.mxu2 %v1183_v9 }
  0x57   :  { %814 = vmatpush.bf16.msrb.mxu3 %v1175_v14 }
  0x58   :  { %585 = vmatpush.bf16.msrb.mxu0 %v1166_v38 }
  0x59   :  { %647 = vmatpush.bf16.msrb.mxu1 %v1141_v39 }
  0x5a   :  { %753 = vmatpush.bf16.msrb.mxu2 %v1182_v11 }
  0x5b   :  { %815 = vmatpush.bf16.msrb.mxu3 %v1174_v16 }
  0x5c   :  { %586 = vmatpush.bf16.msrb.mxu0 %v1165_v42 }
  0x5d   :  { %648 = vmatpush.bf16.msrb.mxu1 %v1140_v43 }
  0x5e   :  { %754 = vmatpush.bf16.msrb.mxu2 %v1181_v13 }
  0x5f   :  { %816 = vmatpush.bf16.msrb.mxu3 %v1173_v17 }
  0x60   :  { %587 = vmatpush.bf16.msrb.mxu0 %v1164_v46 }
  0x61   :  { %649 = vmatpush.bf16.msrb.mxu1 %v1139_v47 }
  0x62   :  { %755 = vmatpush.bf16.msrb.mxu2 %v1180_v15 }
  0x63   :  { %817 = vmatpush.bf16.msrb.mxu3 %v1172_v18 }
  0xc0   :  { %v236_v57 = vpop.f32.mrf.mxu0 }
  0xc1   :  { %v363_v58 = vpop.f32.mrf.mxu1  ;;  %v237_v62 = vadd.f32 %v236_v57, %v172_v60 }
  0xc2   :  { %v364_v61 = vadd.f32 %v363_v58, %v299_v59 }
  0xc3   :  { %v241_v4 = vand.u32 2147483647, %v237_v62 }
  0xc4   :  { %v368_v1 = vand.u32 2147483647, %v364_v61 }
  0xc5   :  { %vm243_vm4 = vcmp.ge.f32.partialorder %v241_v4, 0.05 }
  0xc6   :  { %vm370_vm0 = vcmp.ge.f32.partialorder %v368_v1, 0.05 }
  0xc8   :  { %v238_v63 = vpop.f32.mrf.mxu0 }
  0xc9   :  { %v365_v0 = vpop.f32.mrf.mxu1  ;;  %v239_v2 = vadd.f32 %v238_v63, %v172_v60 }
  0xca   :  { %v366_v3 = vadd.f32 %v365_v0, %v299_v59 }
  0xcb   :  { %v242_v5 = vand.u32 2147483647, %v239_v2  ;;  %v280_v6 = vpack.c.bf16 %v239_v2, %v237_v62 }
  0xcc   :  { %v369_v7 = vand.u32 2147483647, %v366_v3  ;;  %v957_v8 = vpack.c.bf16 %v366_v3, %v364_v61 }
  0xcd   :  { %650 = vmatmul.bf16.vlgmr.msrb.gmra.mxu1 %v280_v6  ;;  %vm244_vm2 = vcmp.ge.f32.partialorder %v242_v5, 0.05 }
  0xce   :  { %588 = vmatmul.bf16.vlgmr.msrb.gmra.mxu0 %v957_v8  ;;  %vm371_vm1 = vcmp.ge.f32.partialorder %v369_v7, 0.05  ;;  %vm991_vm5 = vmpackc.low %vm244_vm2, %vm243_vm4 }
  0xcf   :  { %vm956_vm3 = vmpackc.low %vm371_vm1, %vm370_vm0  ;;  %993 = vmatmul.msk.bf16.vlgmr.msra.gmra.mxu3 %vm991_vm5, %v280_v6 }
  0xd0   :  { %958 = vmatmul.msk.bf16.vlgmr.msra.gmra.mxu2 %vm956_vm3, %v957_v8 }
 0x14a   :  { %v651_v20 = vpop.f32.mrf.mxu1 }
 0x14b   :  { %v589_v19 = vpop.f32.mrf.mxu0 }
 0x14c   :  { %v652_v21 = vadd.f32 %v651_v20, %v589_v19 }
 0x14e   :  { %v663_v27 = vadd.f32 %v662_v22, %v652_v21 }
 0x150   :  { %v665_v30 = vmax.f32 %v663_v27, 0.0 }
 0x152   :  { %v526_v25 = vpop.f32.mrf.mxu3  ;;  %v653_v26 = vpop.f32.mrf.mxu1 }
 0x153   :  { %v464_v23 = vpop.f32.mrf.mxu2  ;;  %v591_v24 = vpop.f32.mrf.mxu0 }
 0x154   :  { %v654_v28 = vadd.f32 %v653_v26, %v591_v24  ;;  %v527_v31 = vadd.f32 %v526_v25, %v464_v23 }
 0x156   :  { %v664_v29 = vadd.f32 %v662_v22, %v654_v28  ;;  %v657_v37 = vadd.f32 %v656_v32, %v527_v31 }
 0x158   :  { %v666_v33 = vmax.f32 %v664_v29, 0.0  ;;  %v659_v40 = vmax.f32 %v657_v37, 0.0 }
 0x15a   :  { %v667_v35 = vpack.c.bf16 %v666_v33, %v665_v30  ;;  %v528_v36 = vpop.f32.mrf.mxu3 }
 0x15b   :  { %v466_v34 = vpop.f32.mrf.mxu2 }
 0x15c   :  { %v529_v38 = vadd.f32 %v528_v36, %v466_v34  ;;  %756 = vmatmul.bf16.vlgmr.msrb.gmra.mxu2 %v667_v35 }
 0x15e   :  { %v658_v39 = vadd.f32 %v656_v32, %v529_v38 }
 0x160   :  { %v660_v41 = vmax.f32 %v658_v39, 0.0 }
 0x162   :  { %v661_v42 = vpack.c.bf16 %v660_v41, %v659_v40 }
 0x164   :  { %818 = vmatmul.bf16.vlgmr.msrb.gmra.mxu3 %v661_v42 }
 0x1df   :  { %v757_v43 = vpop.f32.mrf.mxu2 }
 0x1e7   :  { %v819_v45 = vpop.f32.mrf.mxu3  ;;  %v759_v48 = vpop.f32.mrf.mxu2 }
 0x1e8   :  { %v820_v46 = vadd.f32 %v819_v45, %v757_v43 }
 0x1ea   :  { %v825_v47 = vadd.f32 %v824_v44, %v820_v46 }
 0x1ec   :  { %827 = vst [vmem:[#allocation16] sm:$0xff] %v825_v47 }
 0x1ef   :  { %v821_v49 = vpop.f32.mrf.mxu3 }
 0x1f0   :  { %v822_v50 = vadd.f32 %v821_v49, %v759_v48 }
 0x1f2   :  { %v826_v51 = vadd.f32 %v824_v44, %v822_v50 }
 0x1f4   :  { %828 = vst [vmem:[#allocation16 + $0x8] sm:$0xff] %v826_v51 }
 0x1f5   :  { %841 = dma.vmem_to_hbm [thread:$0]  %s834_s13, 256, %s836_s19, [#allocation4], %s1440_s20, %s1440_s20, %s1441_s21  }
 0x1f6   :  { %1427 = dma.done.wait [#allocation4], 256  }
 0x1f7   :  { %1428 = vsyncadd [#allocation4], 4294967040 }
 0x1f8   :  { %846 = vsyncpa [#allocation3], 1 }
 0x1f9   :  { %847 = vsyncpa [#allocation6], 1 }
 0x1fa   :  { %848 = vsyncpa [#allocation9], 1 }
 0x1fb   :  { %849 = vsyncpa [#allocation12], 1 }
 0x1fc   :  { %850 = vsyncpa [#allocation15], 1 }
 0x1fd   :  { %851 = vsyncpa [#allocation4], 1 }

</bundles_post_ra>
